<compile_context>
chip_gen: v5e
topology: v5e:2x2
jax: 0.10.0
libtpu: 0.0.40
codegen_flags: <defaults>
</compile_context>

<pallas_src>
import functools

import jax
import jax.numpy as jnp
from jax import lax
from jax.experimental import pallas as pl
from jax.experimental.pallas import tpu as pltpu

# Older jax releases named this TPUCompilerParams; keep a graceful fallback.
_CompilerParams = getattr(pltpu, "CompilerParams", None) or getattr(
    pltpu, "TPUCompilerParams", None)


def _layer_norm(y, gamma, beta, eps=1e-6):
    mu = jnp.mean(y, axis=-1, keepdims=True)
    var = jnp.mean((y - mu) ** 2, axis=-1, keepdims=True)
    return (y - mu) * lax.rsqrt(var + eps) * gamma + beta


def encoder_layer_kernel(
    x_ref,                    # (1, L, D)   full sequence for current batch (f32)
    wq_ref, wk_ref, wv_ref,   # per-head (H, D, d_k/d_v) or fused (D, H*d_k / H*d_v)
    wfc_ref,                  # (H*d_v, D)
    ln1g_ref, ln1b_ref,       # (1, D)
    w1_ref, b1_ref,           # (D, d_inner), (1, d_inner)
    w2_ref, b2_ref,           # (d_inner, D), (1, D)
    ln2g_ref, ln2b_ref,       # (1, D)
    out_ref,                  # (1, tL, D)
    attn_ref,                 # (1, H, tL, L)
    k_scratch,                # (H, L, d_k)  compute dtype
    v_scratch,                # (H, L, d_v)  compute dtype
    o_scratch,                # (tL, H*d_v)  compute dtype
    *, n_head, d_k, d_v, seq_tile, fuse_qkv, compute_dtype, approx_recip,
):
    l = pl.program_id(1)

    # ---- K / V for the whole sequence: computed once per batch element (l == 0),
    # kept resident in VMEM scratch across all sequence tiles. ----
    @pl.when(l == 0)
    def _():
        x_full = x_ref[0].astype(compute_dtype)                          # (L, D)
        if fuse_qkv:
            # Lane-dense fused projections; per-head slices are 128-aligned.
            k_all = jnp.dot(x_full, wk_ref[...], preferred_element_type=jnp.float32)
            v_all = jnp.dot(x_full, wv_ref[...], preferred_element_type=jnp.float32)
            for h in range(n_head):
                k_scratch[h] = k_all[:, h * d_k:(h + 1) * d_k].astype(k_scratch.dtype)
                v_scratch[h] = v_all[:, h * d_v:(h + 1) * d_v].astype(v_scratch.dtype)
        else:
            for h in range(n_head):
                k_scratch[h] = jnp.dot(
                    x_full, wk_ref[h],
                    preferred_element_type=jnp.float32).astype(k_scratch.dtype)
                v_scratch[h] = jnp.dot(
                    x_full, wv_ref[h],
                    preferred_element_type=jnp.float32).astype(v_scratch.dtype)

    # ---- query tile (also the residual), f32; matmul operands cast to compute dtype ----
    start = pl.multiple_of(l * seq_tile, seq_tile)
    x_tile = x_ref[0, pl.ds(start, seq_tile), :]                         # (tL, D) f32
    residual = x_tile
    xq = x_tile.astype(compute_dtype)

    if fuse_qkv:
        q_all = jnp.dot(xq, wq_ref[...], preferred_element_type=jnp.float32)

    # ---- multi-head attention (scale pre-folded into W_q) ----
    for h in range(n_head):
        if fuse_qkv:
            qh = q_all[:, h * d_k:(h + 1) * d_k]
        else:
            qh = jnp.dot(xq, wq_ref[h], preferred_element_type=jnp.float32)   # (tL, d_k)

        # q @ k^T without materializing a transpose: contract last dims of both.
        scores = lax.dot_general(
            qh.astype(compute_dtype), k_scratch[h],
            dimension_numbers=(((1,), (1,)), ((), ())),
            preferred_element_type=jnp.float32)                               # (tL, L)

        scores = scores - jnp.max(scores, axis=-1, keepdims=True)
        p = jnp.exp(scores)
        denom = jnp.sum(p, axis=-1, keepdims=True)
        if approx_recip:
            p = p * pl.reciprocal(denom, approx=True)      # EUP slot, nearly free
        else:
            p = p / denom                                  # exact (matches reference)
        attn_ref[0, h] = p.astype(attn_ref.dtype)

        # Head output into VMEM scratch at lane offset h*d_v (no concat, bounded vregs).
        o_scratch[:, h * d_v:(h + 1) * d_v] = jnp.dot(
            p.astype(compute_dtype), v_scratch[h],
            preferred_element_type=jnp.float32).astype(o_scratch.dtype)

    # Single lane-dense K = n_head*d_v matmul with W_fc.
    fc_out = jnp.dot(o_scratch[...], wfc_ref[...], preferred_element_type=jnp.float32)

    # residual + layer norm 1 (f32)
    q_out = _layer_norm(fc_out + residual, ln1g_ref[...], ln1b_ref[...])

    # position-wise feed-forward (matmul operands in compute dtype, math in f32)
    h1 = jnp.maximum(
        jnp.dot(q_out.astype(compute_dtype), w1_ref[...],
                preferred_element_type=jnp.float32) + b1_ref[...], 0.0)
    h2 = jnp.dot(h1.astype(compute_dtype), w2_ref[...],
                 preferred_element_type=jnp.float32) + b2_ref[...]
    out = _layer_norm(h2 + q_out, ln2g_ref[...], ln2b_ref[...])

    out_ref[0] = out.astype(out_ref.dtype)


def encoder_layer(x, params, *, n_head, d_k, d_v, seq_tile=None,
                  compute_dtype=jnp.float32, approx_recip=None):
    B, L, D = x.shape
    (wq, wk, wv, wfc, ln1g, ln1b, w1, b1, w2, b2, ln2g, ln2b) = params
    d_inner = w1.shape[1]

    if seq_tile is None:
        # 256-multiples fill the v6e/v7x 256x256 MXU; use 128-multiples on v5e.
        seq_tile = min(L, 256)
    assert L % seq_tile == 0
    n_ltiles = L // seq_tile

    if approx_recip is None:
        approx_recip = (compute_dtype == jnp.bfloat16)
    attn_dtype = jnp.bfloat16 if compute_dtype == jnp.bfloat16 else jnp.float32

    # Fused lane-dense QKV projections only when per-head slices are 128-aligned.
    fuse_qkv = (d_k % 128 == 0) and (d_v % 128 == 0)

    # Fold 1/sqrt(d_k) into W_q (in f32, before any bf16 cast).
    wq_s = wq * (d_k ** -0.5)
    if fuse_qkv:
        wq_k = wq_s.astype(compute_dtype)
        wk_k = wk.astype(compute_dtype)
        wv_k = wv.astype(compute_dtype)
        wq_shape, wk_shape, wv_shape = (D, n_head * d_k), (D, n_head * d_k), (D, n_head * d_v)
    else:
        wq_k = wq_s.reshape(D, n_head, d_k).transpose(1, 0, 2).astype(compute_dtype)
        wk_k = wk.reshape(D, n_head, d_k).transpose(1, 0, 2).astype(compute_dtype)
        wv_k = wv.reshape(D, n_head, d_v).transpose(1, 0, 2).astype(compute_dtype)
        wq_shape, wk_shape, wv_shape = (n_head, D, d_k), (n_head, D, d_k), (n_head, D, d_v)

    wfc_k = wfc.astype(compute_dtype)
    w1_k = w1.astype(compute_dtype)
    w2_k = w2.astype(compute_dtype)
    # LayerNorm params and biases stay f32 (elementwise path).

    kernel = functools.partial(
        encoder_layer_kernel, n_head=n_head, d_k=d_k, d_v=d_v, seq_tile=seq_tile,
        fuse_qkv=fuse_qkv, compute_dtype=compute_dtype, approx_recip=approx_recip)

    def build(perf_features):
        def wspec(shape):
            # Constant index_map: weight block stays resident across the whole grid.
            if perf_features:
                return pl.BlockSpec(shape, lambda b, l: (0,) * len(shape),
                                    pipeline_mode=pl.Buffered(1))
            return pl.BlockSpec(shape, lambda b, l: (0,) * len(shape))

        grid_spec = pltpu.PrefetchScalarGridSpec(
            num_scalar_prefetch=0,
            grid=(B, n_ltiles),
            in_specs=[
                pl.BlockSpec((1, L, D), lambda b, l: (b, 0, 0)),   # x (full seq per batch)
                wspec(wq_shape), wspec(wk_shape), wspec(wv_shape),
                wspec((n_head * d_v, D)),                          # wfc
                wspec((1, D)), wspec((1, D)),                      # ln1 gamma/beta
                wspec((D, d_inner)), wspec((1, d_inner)),          # w1, b1
                wspec((d_inner, D)), wspec((1, D)),                # w2, b2
                wspec((1, D)), wspec((1, D)),                      # ln2 gamma/beta
            ],
            out_specs=[
                pl.BlockSpec((1, seq_tile, D), lambda b, l: (b, l, 0)),            # enc_output
                pl.BlockSpec((1, n_head, seq_tile, L), lambda b, l: (b, 0, l, 0)),  # attn
            ],
            scratch_shapes=[
                pltpu.VMEM((n_head, L, d_k), compute_dtype),        # K, full sequence
                pltpu.VMEM((n_head, L, d_v), compute_dtype),        # V, full sequence
                pltpu.VMEM((seq_tile, n_head * d_v), compute_dtype),  # concat head outputs
            ],
        )
        cp_kwargs = dict(dimension_semantics=("parallel", "arbitrary"))
        if perf_features:
            # Explicit scoped-VMEM budget sized for v7x's 64 MiB physical VMEM.
            cp_kwargs["vmem_limit_bytes"] = 48 * 1024 * 1024
        return pl.pallas_call(
            kernel,
            out_shape=(
                jax.ShapeDtypeStruct((B, L, D), x.dtype),
                jax.ShapeDtypeStruct((B, n_head, L, L), attn_dtype),
            ),
            grid_spec=grid_spec,
            compiler_params=_CompilerParams(**cp_kwargs),
        )

    args = (x, wq_k, wk_k, wv_k, wfc_k, ln1g, ln1b, w1_k, b1, w2_k, b2, ln2g, ln2b)
    try:
        out, attn = build(True)(*args)
        jax.block_until_ready((out, attn))
    except Exception:
        # pl.Buffered(1) / vmem_limit_bytes not supported by this jax build — fall back
        # to default double-buffered weight blocks (correctness unchanged).
        out, attn = build(False)(*args)
    return out, attn


def reference(x, params, *, n_head, d_k, d_v):
    """Pure-JAX reference reproducing the PyTorch forward (eval mode, mask=None)."""
    (wq, wk, wv, wfc, ln1g, ln1b, w1, b1, w2, b2, ln2g, ln2b) = params
    B, L, D = x.shape

    def ln(y, g, b, eps=1e-6):
        mu = y.mean(-1, keepdims=True)
        var = ((y - mu) ** 2).mean(-1, keepdims=True)
        return (y - mu) / jnp.sqrt(var + eps) * g + b

    residual = x
    q = (x @ wq).reshape(B, L, n_head, d_k).transpose(0, 2, 1, 3)
    k = (x @ wk).reshape(B, L, n_head, d_k).transpose(0, 2, 1, 3)
    v = (x @ wv).reshape(B, L, n_head, d_v).transpose(0, 2, 1, 3)
    scores = jnp.einsum("bhqd,bhkd->bhqk", q / (d_k ** 0.5), k)
    attn = jax.nn.softmax(scores, axis=-1)
    o = jnp.einsum("bhqk,bhkd->bhqd", attn, v)
    o = o.transpose(0, 2, 1, 3).reshape(B, L, n_head * d_v)
    o = o @ wfc + residual
    o = ln(o, ln1g[0], ln1b[0])
    ffn = jnp.maximum(o @ w1 + b1[0], 0.0) @ w2 + b2[0]
    out = ln(ffn + o, ln2g[0], ln2b[0])
    return out, attn


def make_params(key, d_model, d_inner, n_head, d_k, d_v):
    ks = jax.random.split(key, 8)
    scale = 0.1
    wq = scale * jax.random.normal(ks[0], (d_model, n_head * d_k), jnp.float32)
    wk = scale * jax.random.normal(ks[1], (d_model, n_head * d_k), jnp.float32)
    wv = scale * jax.random.normal(ks[2], (d_model, n_head * d_v), jnp.float32)
    wfc = scale * jax.random.normal(ks[3], (n_head * d_v, d_model), jnp.float32)
    ln1g = jnp.ones((1, d_model), jnp.float32)
    ln1b = jnp.zeros((1, d_model), jnp.float32)
    w1 = scale * jax.random.normal(ks[4], (d_model, d_inner), jnp.float32)
    b1 = scale * jax.random.normal(ks[5], (1, d_inner), jnp.float32)
    w2 = scale * jax.random.normal(ks[6], (d_inner, d_model), jnp.float32)
    b2 = scale * jax.random.normal(ks[7], (1, d_model), jnp.float32)
    ln2g = jnp.ones((1, d_model), jnp.float32)
    ln2b = jnp.zeros((1, d_model), jnp.float32)
    return (wq, wk, wv, wfc, ln1g, ln1b, w1, b1, w2, b2, ln2g, ln2b)


if __name__ == "__main__":
    # Small shapes consistent with the module: B=2, L=8, d_model=32, d_inner=64,
    # n_head=2, d_k=d_v=16.
    B, L = 2, 8
    d_model, d_inner, n_head, d_k, d_v = 32, 64, 2, 16, 16

    key = jax.random.PRNGKey(0)
    kx, kp = jax.random.split(key)
    x = jax.random.normal(kx, (B, L, d_model), jnp.float32)
    params = make_params(kp, d_model, d_inner, n_head, d_k, d_v)

    ref_out, ref_attn = reference(x, params, n_head=n_head, d_k=d_k, d_v=d_v)

    # f32-operand path: tight tolerance against the reference.
    out, attn = encoder_layer(x, params, n_head=n_head, d_k=d_k, d_v=d_v,
                              compute_dtype=jnp.float32)
    out = jax.block_until_ready(out)
    attn = jax.block_until_ready(attn)
    assert jnp.allclose(out, ref_out, atol=1e-4, rtol=1e-4), "f32 output mismatch"
    assert jnp.allclose(attn, ref_attn, atol=1e-4, rtol=1e-4), "f32 attn mismatch"

    # bf16 MXU-operand production path (f32 accumulation, bf16 attn writeback,
    # approx reciprocal): relaxed tolerance.
    out_bf, attn_bf = encoder_layer(x, params, n_head=n_head, d_k=d_k, d_v=d_v,
                                    compute_dtype=jnp.bfloat16)
    out_bf = jax.block_until_ready(out_bf)
    attn_bf = jax.block_until_ready(attn_bf)
    assert jnp.allclose(out_bf.astype(jnp.float32), ref_out,
                        atol=5e-2, rtol=5e-2), "bf16 output mismatch"
    assert jnp.allclose(attn_bf.astype(jnp.float32), ref_attn,
                        atol=5e-2, rtol=5e-2), "bf16 attn mismatch"

    print("KERNEL_OK")
</pallas_src>

<mosaic_0001>
module attributes {stable_mosaic.version = 11 : i64} {
  func.func @encoder_layer_kernel(%arg0: i32, %arg1: i32, %arg2: memref<1x8x32xf32, #tpu.memory_space<vmem>>, %arg3: memref<2x32x16xf32, #tpu.memory_space<vmem>>, %arg4: memref<2x32x16xf32, #tpu.memory_space<vmem>>, %arg5: memref<2x32x16xf32, #tpu.memory_space<vmem>>, %arg6: memref<32x32xf32, #tpu.memory_space<vmem>>, %arg7: memref<1x32xf32, #tpu.memory_space<vmem>>, %arg8: memref<1x32xf32, #tpu.memory_space<vmem>>, %arg9: memref<32x64xf32, #tpu.memory_space<vmem>>, %arg10: memref<1x64xf32, #tpu.memory_space<vmem>>, %arg11: memref<64x32xf32, #tpu.memory_space<vmem>>, %arg12: memref<1x32xf32, #tpu.memory_space<vmem>>, %arg13: memref<1x32xf32, #tpu.memory_space<vmem>>, %arg14: memref<1x32xf32, #tpu.memory_space<vmem>>, %arg15: memref<1x8x32xf32, #tpu.memory_space<vmem>>, %arg16: memref<1x2x8x8xf32, #tpu.memory_space<vmem>>, %arg17: memref<2x8x16xf32, #tpu.memory_space<vmem>>, %arg18: memref<2x8x16xf32, #tpu.memory_space<vmem>>, %arg19: memref<8x32xf32, #tpu.memory_space<vmem>>) attributes {dimension_semantics = [#tpu.dimension_semantics<parallel>, #tpu.dimension_semantics<arbitrary>], iteration_bounds = array<i64: 2, 1>, scalar_prefetch = 0 : i64, scratch_operands = 3 : i64, tpu.core_type = #tpu.core_type<tc>, window_params = [{transform_indices = @transform_0, window_bounds = array<i64: 1, 8, 32>}, {pipeline_mode = #tpu.pipeline_mode<synchronous>, transform_indices = @transform_1, window_bounds = array<i64: 2, 32, 16>}, {pipeline_mode = #tpu.pipeline_mode<synchronous>, transform_indices = @transform_2, window_bounds = array<i64: 2, 32, 16>}, {pipeline_mode = #tpu.pipeline_mode<synchronous>, transform_indices = @transform_3, window_bounds = array<i64: 2, 32, 16>}, {pipeline_mode = #tpu.pipeline_mode<synchronous>, transform_indices = @transform_4, window_bounds = array<i64: 32, 32>}, {pipeline_mode = #tpu.pipeline_mode<synchronous>, transform_indices = @transform_5, window_bounds = array<i64: 1, 32>}, {pipeline_mode = #tpu.pipeline_mode<synchronous>, transform_indices = @transform_6, window_bounds = array<i64: 1, 32>}, {pipeline_mode = #tpu.pipeline_mode<synchronous>, transform_indices = @transform_7, window_bounds = array<i64: 32, 64>}, {pipeline_mode = #tpu.pipeline_mode<synchronous>, transform_indices = @transform_8, window_bounds = array<i64: 1, 64>}, {pipeline_mode = #tpu.pipeline_mode<synchronous>, transform_indices = @transform_9, window_bounds = array<i64: 64, 32>}, {pipeline_mode = #tpu.pipeline_mode<synchronous>, transform_indices = @transform_10, window_bounds = array<i64: 1, 32>}, {pipeline_mode = #tpu.pipeline_mode<synchronous>, transform_indices = @transform_11, window_bounds = array<i64: 1, 32>}, {pipeline_mode = #tpu.pipeline_mode<synchronous>, transform_indices = @transform_12, window_bounds = array<i64: 1, 32>}, {transform_indices = @transform_13, window_bounds = array<i64: 1, 8, 32>}, {transform_indices = @transform_14, window_bounds = array<i64: 1, 2, 8, 8>}]} {
    %c0_i32 = arith.constant 0 : i32
    %0 = arith.cmpi eq, %arg1, %c0_i32 : i32
    %1 = arith.extui %0 : i1 to i32
    %c0_i32_0 = arith.constant 0 : i32
    %2 = arith.cmpi ne, %1, %c0_i32_0 : i32
    scf.if %2 {
      %c0_76 = arith.constant 0 : index
      %c0_77 = arith.constant 0 : index
      %c0_78 = arith.constant 0 : index
      %120 = vector.load %arg2[%c0_76, %c0_77, %c0_78] : memref<1x8x32xf32, #tpu.memory_space<vmem>>, vector<1x8x32xf32>
      %121 = vector.shape_cast %120 : vector<1x8x32xf32> to vector<8x32xf32>
      %c0_79 = arith.constant 0 : index
      %c0_80 = arith.constant 0 : index
      %c0_81 = arith.constant 0 : index
      %122 = vector.load %arg4[%c0_79, %c0_80, %c0_81] : memref<2x32x16xf32, #tpu.memory_space<vmem>>, vector<1x32x16xf32>
      %123 = vector.shape_cast %122 : vector<1x32x16xf32> to vector<32x16xf32>
      %cst_82 = arith.constant dense<0.000000e+00> : vector<8x16xf32>
      %124 = tpu.matmul %121, %123, %cst_82 {dimension_numbers = #tpu.dot_dimension_numbers<[1], [0], [0], [1], [0, 0, 1, 1], [], []>} : vector<8x32xf32>, vector<32x16xf32>, vector<8x16xf32> -> vector<8x16xf32>
      %c0_83 = arith.constant 0 : index
      %c0_84 = arith.constant 0 : index
      %c0_85 = arith.constant 0 : index
      %125 = vector.load %arg17[%c0_83, %c0_84, %c0_85] : memref<2x8x16xf32, #tpu.memory_space<vmem>>, vector<1x8x16xf32>
      %126 = vector.shape_cast %125 : vector<1x8x16xf32> to vector<8x16xf32>
      %127 = vector.shape_cast %124 : vector<8x16xf32> to vector<1x8x16xf32>
      tpu.vector_store %arg17[%c0_83, %c0_84, %c0_85], %127 {strides = array<i32>} : memref<2x8x16xf32, #tpu.memory_space<vmem>>, vector<1x8x16xf32>,
      %c0_86 = arith.constant 0 : index
      %c0_87 = arith.constant 0 : index
      %c0_88 = arith.constant 0 : index
      %128 = vector.load %arg5[%c0_86, %c0_87, %c0_88] : memref<2x32x16xf32, #tpu.memory_space<vmem>>, vector<1x32x16xf32>
      %129 = vector.shape_cast %128 : vector<1x32x16xf32> to vector<32x16xf32>
      %cst_89 = arith.constant dense<0.000000e+00> : vector<8x16xf32>
      %130 = tpu.matmul %121, %129, %cst_89 {dimension_numbers = #tpu.dot_dimension_numbers<[1], [0], [0], [1], [0, 0, 1, 1], [], []>} : vector<8x32xf32>, vector<32x16xf32>, vector<8x16xf32> -> vector<8x16xf32>
      %c0_90 = arith.constant 0 : index
      %c0_91 = arith.constant 0 : index
      %c0_92 = arith.constant 0 : index
      %131 = vector.load %arg18[%c0_90, %c0_91, %c0_92] : memref<2x8x16xf32, #tpu.memory_space<vmem>>, vector<1x8x16xf32>
      %132 = vector.shape_cast %131 : vector<1x8x16xf32> to vector<8x16xf32>
      %133 = vector.shape_cast %130 : vector<8x16xf32> to vector<1x8x16xf32>
      tpu.vector_store %arg18[%c0_90, %c0_91, %c0_92], %133 {strides = array<i32>} : memref<2x8x16xf32, #tpu.memory_space<vmem>>, vector<1x8x16xf32>,
      %c1_93 = arith.constant 1 : index
      %c0_94 = arith.constant 0 : index
      %c0_95 = arith.constant 0 : index
      %134 = vector.load %arg4[%c1_93, %c0_94, %c0_95] : memref<2x32x16xf32, #tpu.memory_space<vmem>>, vector<1x32x16xf32>
      %135 = vector.shape_cast %134 : vector<1x32x16xf32> to vector<32x16xf32>
      %cst_96 = arith.constant dense<0.000000e+00> : vector<8x16xf32>
      %136 = tpu.matmul %121, %135, %cst_96 {dimension_numbers = #tpu.dot_dimension_numbers<[1], [0], [0], [1], [0, 0, 1, 1], [], []>} : vector<8x32xf32>, vector<32x16xf32>, vector<8x16xf32> -> vector<8x16xf32>
      %c1_97 = arith.constant 1 : index
      %c0_98 = arith.constant 0 : index
      %c0_99 = arith.constant 0 : index
      %137 = vector.load %arg17[%c1_97, %c0_98, %c0_99] : memref<2x8x16xf32, #tpu.memory_space<vmem>>, vector<1x8x16xf32>
      %138 = vector.shape_cast %137 : vector<1x8x16xf32> to vector<8x16xf32>
      %139 = vector.shape_cast %136 : vector<8x16xf32> to vector<1x8x16xf32>
      tpu.vector_store %arg17[%c1_97, %c0_98, %c0_99], %139 {strides = array<i32>} : memref<2x8x16xf32, #tpu.memory_space<vmem>>, vector<1x8x16xf32>,
      %c1_100 = arith.constant 1 : index
      %c0_101 = arith.constant 0 : index
      %c0_102 = arith.constant 0 : index
      %140 = vector.load %arg5[%c1_100, %c0_101, %c0_102] : memref<2x32x16xf32, #tpu.memory_space<vmem>>, vector<1x32x16xf32>
      %141 = vector.shape_cast %140 : vector<1x32x16xf32> to vector<32x16xf32>
      %cst_103 = arith.constant dense<0.000000e+00> : vector<8x16xf32>
      %142 = tpu.matmul %121, %141, %cst_103 {dimension_numbers = #tpu.dot_dimension_numbers<[1], [0], [0], [1], [0, 0, 1, 1], [], []>} : vector<8x32xf32>, vector<32x16xf32>, vector<8x16xf32> -> vector<8x16xf32>
      %c1_104 = arith.constant 1 : index
      %c0_105 = arith.constant 0 : index
      %c0_106 = arith.constant 0 : index
      %143 = vector.load %arg18[%c1_104, %c0_105, %c0_106] : memref<2x8x16xf32, #tpu.memory_space<vmem>>, vector<1x8x16xf32>
      %144 = vector.shape_cast %143 : vector<1x8x16xf32> to vector<8x16xf32>
      %145 = vector.shape_cast %142 : vector<8x16xf32> to vector<1x8x16xf32>
      tpu.vector_store %arg18[%c1_104, %c0_105, %c0_106], %145 {strides = array<i32>} : memref<2x8x16xf32, #tpu.memory_space<vmem>>, vector<1x8x16xf32>,
    } else {
    }
    %c8_i32 = arith.constant 8 : i32
    %3 = arith.muli %arg1, %c8_i32 : i32
    %4 = tpu.assume_multiple %3, 8 : i32
    %c0 = arith.constant 0 : index
    %5 = arith.index_cast %4 : i32 to index
    %c0_1 = arith.constant 0 : index
    %6 = vector.load %arg2[%c0, %5, %c0_1] : memref<1x8x32xf32, #tpu.memory_space<vmem>>, vector<1x8x32xf32>
    %7 = vector.shape_cast %6 : vector<1x8x32xf32> to vector<8x32xf32>
    %c0_2 = arith.constant 0 : index
    %c0_3 = arith.constant 0 : index
    %c0_4 = arith.constant 0 : index
    %8 = vector.load %arg3[%c0_2, %c0_3, %c0_4] : memref<2x32x16xf32, #tpu.memory_space<vmem>>, vector<1x32x16xf32>
    %9 = vector.shape_cast %8 : vector<1x32x16xf32> to vector<32x16xf32>
    %cst = arith.constant dense<0.000000e+00> : vector<8x16xf32>
    %10 = tpu.matmul %7, %9, %cst {dimension_numbers = #tpu.dot_dimension_numbers<[1], [0], [0], [1], [0, 0, 1, 1], [], []>} : vector<8x32xf32>, vector<32x16xf32>, vector<8x16xf32> -> vector<8x16xf32>
    %c0_5 = arith.constant 0 : index
    %c0_6 = arith.constant 0 : index
    %c0_7 = arith.constant 0 : index
    %11 = vector.load %arg17[%c0_5, %c0_6, %c0_7] : memref<2x8x16xf32, #tpu.memory_space<vmem>>, vector<1x8x16xf32>
    %12 = vector.shape_cast %11 : vector<1x8x16xf32> to vector<8x16xf32>
    %cst_8 = arith.constant dense<0.000000e+00> : vector<8x8xf32>
    %13 = tpu.matmul %10, %12, %cst_8 {dimension_numbers = #tpu.dot_dimension_numbers<[1], [1], [0], [0], [0, 0, 1, 0], [], []>} : vector<8x16xf32>, vector<8x16xf32>, vector<8x8xf32> -> vector<8x8xf32>
    %cst_9 = arith.constant dense<0xFF800000> : vector<8xf32>
    %14 = vector.multi_reduction <maximumf>, %13, %cst_9 [1] : vector<8x8xf32> to vector<8xf32>
    %15 = vector.shape_cast %14 : vector<8xf32> to vector<8x1xf32>
    %16 = vector.broadcast %15 : vector<8x1xf32> to vector<8x8xf32>
    %17 = arith.subf %13, %16 : vector<8x8xf32>
    %18 = math.exp %17 : vector<8x8xf32>
    %cst_10 = arith.constant dense<0.000000e+00> : vector<8xf32>
    %19 = vector.multi_reduction <add>, %18, %cst_10 [1] : vector<8x8xf32> to vector<8xf32>
    %20 = vector.shape_cast %19 : vector<8xf32> to vector<8x1xf32>
    %21 = vector.broadcast %20 : vector<8x1xf32> to vector<8x8xf32>
    %22 = arith.divf %18, %21 : vector<8x8xf32>
    %c0_11 = arith.constant 0 : index
    %c0_12 = arith.constant 0 : index
    %c0_13 = arith.constant 0 : index
    %c0_14 = arith.constant 0 : index
    %23 = vector.load %arg16[%c0_11, %c0_12, %c0_13, %c0_14] : memref<1x2x8x8xf32, #tpu.memory_space<vmem>>, vector<1x1x8x8xf32>
    %24 = vector.shape_cast %23 : vector<1x1x8x8xf32> to vector<8x8xf32>
    %25 = vector.shape_cast %22 : vector<8x8xf32> to vector<1x1x8x8xf32>
    tpu.vector_store %arg16[%c0_11, %c0_12, %c0_13, %c0_14], %25 {strides = array<i32>} : memref<1x2x8x8xf32, #tpu.memory_space<vmem>>, vector<1x1x8x8xf32>,
    %c0_15 = arith.constant 0 : index
    %c0_16 = arith.constant 0 : index
    %c0_17 = arith.constant 0 : index
    %26 = vector.load %arg18[%c0_15, %c0_16, %c0_17] : memref<2x8x16xf32, #tpu.memory_space<vmem>>, vector<1x8x16xf32>
    %27 = vector.shape_cast %26 : vector<1x8x16xf32> to vector<8x16xf32>
    %cst_18 = arith.constant dense<0.000000e+00> : vector<8x16xf32>
    %28 = tpu.matmul %22, %27, %cst_18 {dimension_numbers = #tpu.dot_dimension_numbers<[1], [0], [0], [1], [0, 0, 1, 1], [], []>} : vector<8x8xf32>, vector<8x16xf32>, vector<8x16xf32> -> vector<8x16xf32>
    %c0_19 = arith.constant 0 : index
    %c0_20 = arith.constant 0 : index
    %29 = vector.load %arg19[%c0_19, %c0_20] : memref<8x32xf32, #tpu.memory_space<vmem>>, vector<8x16xf32>
    tpu.vector_store %arg19[%c0_19, %c0_20], %28 {strides = array<i32>} : memref<8x32xf32, #tpu.memory_space<vmem>>, vector<8x16xf32>,
    %c1 = arith.constant 1 : index
    %c0_21 = arith.constant 0 : index
    %c0_22 = arith.constant 0 : index
    %30 = vector.load %arg3[%c1, %c0_21, %c0_22] : memref<2x32x16xf32, #tpu.memory_space<vmem>>, vector<1x32x16xf32>
    %31 = vector.shape_cast %30 : vector<1x32x16xf32> to vector<32x16xf32>
    %cst_23 = arith.constant dense<0.000000e+00> : vector<8x16xf32>
    %32 = tpu.matmul %7, %31, %cst_23 {dimension_numbers = #tpu.dot_dimension_numbers<[1], [0], [0], [1], [0, 0, 1, 1], [], []>} : vector<8x32xf32>, vector<32x16xf32>, vector<8x16xf32> -> vector<8x16xf32>
    %c1_24 = arith.constant 1 : index
    %c0_25 = arith.constant 0 : index
    %c0_26 = arith.constant 0 : index
    %33 = vector.load %arg17[%c1_24, %c0_25, %c0_26] : memref<2x8x16xf32, #tpu.memory_space<vmem>>, vector<1x8x16xf32>
    %34 = vector.shape_cast %33 : vector<1x8x16xf32> to vector<8x16xf32>
    %cst_27 = arith.constant dense<0.000000e+00> : vector<8x8xf32>
    %35 = tpu.matmul %32, %34, %cst_27 {dimension_numbers = #tpu.dot_dimension_numbers<[1], [1], [0], [0], [0, 0, 1, 0], [], []>} : vector<8x16xf32>, vector<8x16xf32>, vector<8x8xf32> -> vector<8x8xf32>
    %cst_28 = arith.constant dense<0xFF800000> : vector<8xf32>
    %36 = vector.multi_reduction <maximumf>, %35, %cst_28 [1] : vector<8x8xf32> to vector<8xf32>
    %37 = vector.shape_cast %36 : vector<8xf32> to vector<8x1xf32>
    %38 = vector.broadcast %37 : vector<8x1xf32> to vector<8x8xf32>
    %39 = arith.subf %35, %38 : vector<8x8xf32>
    %40 = math.exp %39 : vector<8x8xf32>
    %cst_29 = arith.constant dense<0.000000e+00> : vector<8xf32>
    %41 = vector.multi_reduction <add>, %40, %cst_29 [1] : vector<8x8xf32> to vector<8xf32>
    %42 = vector.shape_cast %41 : vector<8xf32> to vector<8x1xf32>
    %43 = vector.broadcast %42 : vector<8x1xf32> to vector<8x8xf32>
    %44 = arith.divf %40, %43 : vector<8x8xf32>
    %c0_30 = arith.constant 0 : index
    %c1_31 = arith.constant 1 : index
    %c0_32 = arith.constant 0 : index
    %c0_33 = arith.constant 0 : index
    %45 = vector.load %arg16[%c0_30, %c1_31, %c0_32, %c0_33] : memref<1x2x8x8xf32, #tpu.memory_space<vmem>>, vector<1x1x8x8xf32>
    %46 = vector.shape_cast %45 : vector<1x1x8x8xf32> to vector<8x8xf32>
    %47 = vector.shape_cast %44 : vector<8x8xf32> to vector<1x1x8x8xf32>
    tpu.vector_store %arg16[%c0_30, %c1_31, %c0_32, %c0_33], %47 {strides = array<i32>} : memref<1x2x8x8xf32, #tpu.memory_space<vmem>>, vector<1x1x8x8xf32>,
    %c1_34 = arith.constant 1 : index
    %c0_35 = arith.constant 0 : index
    %c0_36 = arith.constant 0 : index
    %48 = vector.load %arg18[%c1_34, %c0_35, %c0_36] : memref<2x8x16xf32, #tpu.memory_space<vmem>>, vector<1x8x16xf32>
    %49 = vector.shape_cast %48 : vector<1x8x16xf32> to vector<8x16xf32>
    %cst_37 = arith.constant dense<0.000000e+00> : vector<8x16xf32>
    %50 = tpu.matmul %44, %49, %cst_37 {dimension_numbers = #tpu.dot_dimension_numbers<[1], [0], [0], [1], [0, 0, 1, 1], [], []>} : vector<8x8xf32>, vector<8x16xf32>, vector<8x16xf32> -> vector<8x16xf32>
    %c0_38 = arith.constant 0 : index
    %c16 = arith.constant 16 : index
    %51 = vector.load %arg19[%c0_38, %c16] : memref<8x32xf32, #tpu.memory_space<vmem>>, vector<8x16xf32>
    tpu.vector_store %arg19[%c0_38, %c16], %50 {strides = array<i32>} : memref<8x32xf32, #tpu.memory_space<vmem>>, vector<8x16xf32>,
    %c0_39 = arith.constant 0 : index
    %c0_40 = arith.constant 0 : index
    %52 = vector.load %arg19[%c0_39, %c0_40] : memref<8x32xf32, #tpu.memory_space<vmem>>, vector<8x32xf32>
    %c0_41 = arith.constant 0 : index
    %c0_42 = arith.constant 0 : index
    %53 = vector.load %arg6[%c0_41, %c0_42] : memref<32x32xf32, #tpu.memory_space<vmem>>, vector<32x32xf32>
    %cst_43 = arith.constant dense<0.000000e+00> : vector<8x32xf32>
    %54 = tpu.matmul %52, %53, %cst_43 {dimension_numbers = #tpu.dot_dimension_numbers<[1], [0], [0], [1], [0, 0, 1, 1], [], []>} : vector<8x32xf32>, vector<32x32xf32>, vector<8x32xf32> -> vector<8x32xf32>
    %55 = arith.addf %54, %7 : vector<8x32xf32>
    %c0_44 = arith.constant 0 : index
    %c0_45 = arith.constant 0 : index
    %56 = vector.load %arg7[%c0_44, %c0_45] : memref<1x32xf32, #tpu.memory_space<vmem>>, vector<1x32xf32>
    %c0_46 = arith.constant 0 : index
    %c0_47 = arith.constant 0 : index
    %57 = vector.load %arg8[%c0_46, %c0_47] : memref<1x32xf32, #tpu.memory_space<vmem>>, vector<1x32xf32>
    %cst_48 = arith.constant dense<0.000000e+00> : vector<8xf32>
    %58 = vector.multi_reduction <add>, %55, %cst_48 [1] : vector<8x32xf32> to vector<8xf32>
    %59 = vector.shape_cast %58 : vector<8xf32> to vector<8x1xf32>
    %cst_49 = arith.constant 3.200000e+01 : f32
    %60 = vector.broadcast %cst_49 : f32 to vector<8x1xf32>
    %61 = arith.divf %59, %60 : vector<8x1xf32>
    %62 = vector.broadcast %61 : vector<8x1xf32> to vector<8x32xf32>
    %63 = arith.subf %55, %62 : vector<8x32xf32>
    %64 = arith.mulf %63, %63 : vector<8x32xf32>
    %cst_50 = arith.constant dense<0.000000e+00> : vector<8xf32>
    %65 = vector.multi_reduction <add>, %64, %cst_50 [1] : vector<8x32xf32> to vector<8xf32>
    %66 = vector.shape_cast %65 : vector<8xf32> to vector<8x1xf32>
    %cst_51 = arith.constant 3.200000e+01 : f32
    %67 = vector.broadcast %cst_51 : f32 to vector<8x1xf32>
    %68 = arith.divf %66, %67 : vector<8x1xf32>
    %69 = vector.broadcast %61 : vector<8x1xf32> to vector<8x32xf32>
    %70 = arith.subf %55, %69 : vector<8x32xf32>
    %cst_52 = arith.constant 9.99999997E-7 : f32
    %71 = vector.broadcast %cst_52 : f32 to vector<8x1xf32>
    %72 = arith.addf %68, %71 : vector<8x1xf32>
    %73 = math.rsqrt %72 : vector<8x1xf32>
    %74 = vector.broadcast %73 : vector<8x1xf32> to vector<8x32xf32>
    %75 = arith.mulf %70, %74 : vector<8x32xf32>
    %76 = vector.broadcast %56 : vector<1x32xf32> to vector<8x32xf32>
    %77 = arith.mulf %75, %76 : vector<8x32xf32>
    %78 = vector.broadcast %57 : vector<1x32xf32> to vector<8x32xf32>
    %79 = arith.addf %77, %78 : vector<8x32xf32>
    %c0_53 = arith.constant 0 : index
    %c0_54 = arith.constant 0 : index
    %80 = vector.load %arg9[%c0_53, %c0_54] : memref<32x64xf32, #tpu.memory_space<vmem>>, vector<32x64xf32>
    %cst_55 = arith.constant dense<0.000000e+00> : vector<8x64xf32>
    %81 = tpu.matmul %79, %80, %cst_55 {dimension_numbers = #tpu.dot_dimension_numbers<[1], [0], [0], [1], [0, 0, 1, 1], [], []>} : vector<8x32xf32>, vector<32x64xf32>, vector<8x64xf32> -> vector<8x64xf32>
    %c0_56 = arith.constant 0 : index
    %c0_57 = arith.constant 0 : index
    %82 = vector.load %arg10[%c0_56, %c0_57] : memref<1x64xf32, #tpu.memory_space<vmem>>, vector<1x64xf32>
    %83 = vector.broadcast %82 : vector<1x64xf32> to vector<8x64xf32>
    %84 = arith.addf %81, %83 : vector<8x64xf32>
    %cst_58 = arith.constant 0.000000e+00 : f32
    %85 = vector.broadcast %cst_58 : f32 to vector<8x64xf32>
    %86 = arith.maximumf %84, %85 : vector<8x64xf32>
    %c0_59 = arith.constant 0 : index
    %c0_60 = arith.constant 0 : index
    %87 = vector.load %arg11[%c0_59, %c0_60] : memref<64x32xf32, #tpu.memory_space<vmem>>, vector<64x32xf32>
    %cst_61 = arith.constant dense<0.000000e+00> : vector<8x32xf32>
    %88 = tpu.matmul %86, %87, %cst_61 {dimension_numbers = #tpu.dot_dimension_numbers<[1], [0], [0], [1], [0, 0, 1, 1], [], []>} : vector<8x64xf32>, vector<64x32xf32>, vector<8x32xf32> -> vector<8x32xf32>
    %c0_62 = arith.constant 0 : index
    %c0_63 = arith.constant 0 : index
    %89 = vector.load %arg12[%c0_62, %c0_63] : memref<1x32xf32, #tpu.memory_space<vmem>>, vector<1x32xf32>
    %90 = vector.broadcast %89 : vector<1x32xf32> to vector<8x32xf32>
    %91 = arith.addf %88, %90 : vector<8x32xf32>
    %92 = arith.addf %91, %79 : vector<8x32xf32>
    %c0_64 = arith.constant 0 : index
    %c0_65 = arith.constant 0 : index
    %93 = vector.load %arg13[%c0_64, %c0_65] : memref<1x32xf32, #tpu.memory_space<vmem>>, vector<1x32xf32>
    %c0_66 = arith.constant 0 : index
    %c0_67 = arith.constant 0 : index
    %94 = vector.load %arg14[%c0_66, %c0_67] : memref<1x32xf32, #tpu.memory_space<vmem>>, vector<1x32xf32>
    %cst_68 = arith.constant dense<0.000000e+00> : vector<8xf32>
    %95 = vector.multi_reduction <add>, %92, %cst_68 [1] : vector<8x32xf32> to vector<8xf32>
    %96 = vector.shape_cast %95 : vector<8xf32> to vector<8x1xf32>
    %cst_69 = arith.constant 3.200000e+01 : f32
    %97 = vector.broadcast %cst_69 : f32 to vector<8x1xf32>
    %98 = arith.divf %96, %97 : vector<8x1xf32>
    %99 = vector.broadcast %98 : vector<8x1xf32> to vector<8x32xf32>
    %100 = arith.subf %92, %99 : vector<8x32xf32>
    %101 = arith.mulf %100, %100 : vector<8x32xf32>
    %cst_70 = arith.constant dense<0.000000e+00> : vector<8xf32>
    %102 = vector.multi_reduction <add>, %101, %cst_70 [1] : vector<8x32xf32> to vector<8xf32>
    %103 = vector.shape_cast %102 : vector<8xf32> to vector<8x1xf32>
    %cst_71 = arith.constant 3.200000e+01 : f32
    %104 = vector.broadcast %cst_71 : f32 to vector<8x1xf32>
    %105 = arith.divf %103, %104 : vector<8x1xf32>
    %106 = vector.broadcast %98 : vector<8x1xf32> to vector<8x32xf32>
    %107 = arith.subf %92, %106 : vector<8x32xf32>
    %cst_72 = arith.constant 9.99999997E-7 : f32
    %108 = vector.broadcast %cst_72 : f32 to vector<8x1xf32>
    %109 = arith.addf %105, %108 : vector<8x1xf32>
    %110 = math.rsqrt %109 : vector<8x1xf32>
    %111 = vector.broadcast %110 : vector<8x1xf32> to vector<8x32xf32>
    %112 = arith.mulf %107, %111 : vector<8x32xf32>
    %113 = vector.broadcast %93 : vector<1x32xf32> to vector<8x32xf32>
    %114 = arith.mulf %112, %113 : vector<8x32xf32>
    %115 = vector.broadcast %94 : vector<1x32xf32> to vector<8x32xf32>
    %116 = arith.addf %114, %115 : vector<8x32xf32>
    %c0_73 = arith.constant 0 : index
    %c0_74 = arith.constant 0 : index
    %c0_75 = arith.constant 0 : index
    %117 = vector.load %arg15[%c0_73, %c0_74, %c0_75] : memref<1x8x32xf32, #tpu.memory_space<vmem>>, vector<1x8x32xf32>
    %118 = vector.shape_cast %117 : vector<1x8x32xf32> to vector<8x32xf32>
    %119 = vector.shape_cast %116 : vector<8x32xf32> to vector<1x8x32xf32>
    tpu.vector_store %arg15[%c0_73, %c0_74, %c0_75], %119 {strides = array<i32>} : memref<1x8x32xf32, #tpu.memory_space<vmem>>, vector<1x8x32xf32>,
    return
  }
  func.func @transform_0(%arg0: i32, %arg1: i32) -> (i32, i32, i32) {
    %c0_i32 = arith.constant 0 : i32
    %c0_i32_0 = arith.constant 0 : i32
    %c0_i32_1 = arith.constant 0 : i32
    return %arg0, %c0_i32, %c0_i32_0 : i32, i32, i32
  }
  func.func @transform_1(%arg0: i32, %arg1: i32) -> (i32, i32, i32) {
    %c0_i32 = arith.constant 0 : i32
    %c0_i32_0 = arith.constant 0 : i32
    %c0_i32_1 = arith.constant 0 : i32
    %c0_i32_2 = arith.constant 0 : i32
    return %c0_i32, %c0_i32_0, %c0_i32_1 : i32, i32, i32
  }
  func.func @transform_2(%arg0: i32, %arg1: i32) -> (i32, i32, i32) {
    %c0_i32 = arith.constant 0 : i32
    %c0_i32_0 = arith.constant 0 : i32
    %c0_i32_1 = arith.constant 0 : i32
    %c0_i32_2 = arith.constant 0 : i32
    return %c0_i32, %c0_i32_0, %c0_i32_1 : i32, i32, i32
  }
  func.func @transform_3(%arg0: i32, %arg1: i32) -> (i32, i32, i32) {
    %c0_i32 = arith.constant 0 : i32
    %c0_i32_0 = arith.constant 0 : i32
    %c0_i32_1 = arith.constant 0 : i32
    %c0_i32_2 = arith.constant 0 : i32
    return %c0_i32, %c0_i32_0, %c0_i32_1 : i32, i32, i32
  }
  func.func @transform_4(%arg0: i32, %arg1: i32) -> (i32, i32) {
    %c0_i32 = arith.constant 0 : i32
    %c0_i32_0 = arith.constant 0 : i32
    %c0_i32_1 = arith.constant 0 : i32
    return %c0_i32, %c0_i32_0 : i32, i32
  }
  func.func @transform_5(%arg0: i32, %arg1: i32) -> (i32, i32) {
    %c0_i32 = arith.constant 0 : i32
    %c0_i32_0 = arith.constant 0 : i32
    %c0_i32_1 = arith.constant 0 : i32
    return %c0_i32, %c0_i32_0 : i32, i32
  }
  func.func @transform_6(%arg0: i32, %arg1: i32) -> (i32, i32) {
    %c0_i32 = arith.constant 0 : i32
    %c0_i32_0 = arith.constant 0 : i32
    %c0_i32_1 = arith.constant 0 : i32
    return %c0_i32, %c0_i32_0 : i32, i32
  }
  func.func @transform_7(%arg0: i32, %arg1: i32) -> (i32, i32) {
    %c0_i32 = arith.constant 0 : i32
    %c0_i32_0 = arith.constant 0 : i32
    %c0_i32_1 = arith.constant 0 : i32
    return %c0_i32, %c0_i32_0 : i32, i32
  }
  func.func @transform_8(%arg0: i32, %arg1: i32) -> (i32, i32) {
    %c0_i32 = arith.constant 0 : i32
    %c0_i32_0 = arith.constant 0 : i32
    %c0_i32_1 = arith.constant 0 : i32
    return %c0_i32, %c0_i32_0 : i32, i32
  }
  func.func @transform_9(%arg0: i32, %arg1: i32) -> (i32, i32) {
    %c0_i32 = arith.constant 0 : i32
    %c0_i32_0 = arith.constant 0 : i32
    %c0_i32_1 = arith.constant 0 : i32
    return %c0_i32, %c0_i32_0 : i32, i32
  }
  func.func @transform_10(%arg0: i32, %arg1: i32) -> (i32, i32) {
    %c0_i32 = arith.constant 0 : i32
    %c0_i32_0 = arith.constant 0 : i32
    %c0_i32_1 = arith.constant 0 : i32
    return %c0_i32, %c0_i32_0 : i32, i32
  }
  func.func @transform_11(%arg0: i32, %arg1: i32) -> (i32, i32) {
    %c0_i32 = arith.constant 0 : i32
    %c0_i32_0 = arith.constant 0 : i32
    %c0_i32_1 = arith.constant 0 : i32
    return %c0_i32, %c0_i32_0 : i32, i32
  }
  func.func @transform_12(%arg0: i32, %arg1: i32) -> (i32, i32) {
    %c0_i32 = arith.constant 0 : i32
    %c0_i32_0 = arith.constant 0 : i32
    %c0_i32_1 = arith.constant 0 : i32
    return %c0_i32, %c0_i32_0 : i32, i32
  }
  func.func @transform_13(%arg0: i32, %arg1: i32) -> (i32, i32, i32) {
    %c0_i32 = arith.constant 0 : i32
    %c0_i32_0 = arith.constant 0 : i32
    return %arg0, %arg1, %c0_i32 : i32, i32, i32
  }
  func.func @transform_14(%arg0: i32, %arg1: i32) -> (i32, i32, i32, i32) {
    %c0_i32 = arith.constant 0 : i32
    %c0_i32_0 = arith.constant 0 : i32
    %c0_i32_1 = arith.constant 0 : i32
    return %arg0, %c0_i32, %arg1, %c0_i32_0 : i32, i32, i32, i32
  }
}

module attributes {stable_mosaic.version = 11 : i64} {
  func.func @encoder_layer_kernel(%arg0: i32, %arg1: i32, %arg2: memref<1x8x32xf32, #tpu.memory_space<vmem>>, %arg3: memref<2x32x16xf32, #tpu.memory_space<vmem>>, %arg4: memref<2x32x16xf32, #tpu.memory_space<vmem>>, %arg5: memref<2x32x16xf32, #tpu.memory_space<vmem>>, %arg6: memref<32x32xf32, #tpu.memory_space<vmem>>, %arg7: memref<1x32xf32, #tpu.memory_space<vmem>>, %arg8: memref<1x32xf32, #tpu.memory_space<vmem>>, %arg9: memref<32x64xf32, #tpu.memory_space<vmem>>, %arg10: memref<1x64xf32, #tpu.memory_space<vmem>>, %arg11: memref<64x32xf32, #tpu.memory_space<vmem>>, %arg12: memref<1x32xf32, #tpu.memory_space<vmem>>, %arg13: memref<1x32xf32, #tpu.memory_space<vmem>>, %arg14: memref<1x32xf32, #tpu.memory_space<vmem>>, %arg15: memref<1x8x32xf32, #tpu.memory_space<vmem>>, %arg16: memref<1x2x8x8xf32, #tpu.memory_space<vmem>>, %arg17: memref<2x8x16xf32, #tpu.memory_space<vmem>>, %arg18: memref<2x8x16xf32, #tpu.memory_space<vmem>>, %arg19: memref<8x32xf32, #tpu.memory_space<vmem>>) attributes {dimension_semantics = [#tpu.dimension_semantics<parallel>, #tpu.dimension_semantics<arbitrary>], iteration_bounds = array<i64: 2, 1>, scalar_prefetch = 0 : i64, scratch_operands = 3 : i64, tpu.core_type = #tpu.core_type<tc>, window_params = [{transform_indices = @transform_0, window_bounds = array<i64: 1, 8, 32>}, {pipeline_mode = #tpu.pipeline_mode<synchronous>, transform_indices = @transform_1, window_bounds = array<i64: 2, 32, 16>}, {pipeline_mode = #tpu.pipeline_mode<synchronous>, transform_indices = @transform_2, window_bounds = array<i64: 2, 32, 16>}, {pipeline_mode = #tpu.pipeline_mode<synchronous>, transform_indices = @transform_3, window_bounds = array<i64: 2, 32, 16>}, {pipeline_mode = #tpu.pipeline_mode<synchronous>, transform_indices = @transform_4, window_bounds = array<i64: 32, 32>}, {pipeline_mode = #tpu.pipeline_mode<synchronous>, transform_indices = @transform_5, window_bounds = array<i64: 1, 32>}, {pipeline_mode = #tpu.pipeline_mode<synchronous>, transform_indices = @transform_6, window_bounds = array<i64: 1, 32>}, {pipeline_mode = #tpu.pipeline_mode<synchronous>, transform_indices = @transform_7, window_bounds = array<i64: 32, 64>}, {pipeline_mode = #tpu.pipeline_mode<synchronous>, transform_indices = @transform_8, window_bounds = array<i64: 1, 64>}, {pipeline_mode = #tpu.pipeline_mode<synchronous>, transform_indices = @transform_9, window_bounds = array<i64: 64, 32>}, {pipeline_mode = #tpu.pipeline_mode<synchronous>, transform_indices = @transform_10, window_bounds = array<i64: 1, 32>}, {pipeline_mode = #tpu.pipeline_mode<synchronous>, transform_indices = @transform_11, window_bounds = array<i64: 1, 32>}, {pipeline_mode = #tpu.pipeline_mode<synchronous>, transform_indices = @transform_12, window_bounds = array<i64: 1, 32>}, {transform_indices = @transform_13, window_bounds = array<i64: 1, 8, 32>}, {transform_indices = @transform_14, window_bounds = array<i64: 1, 2, 8, 8>}]} {
    %c0_i32 = arith.constant 0 : i32
    %0 = arith.cmpi eq, %arg1, %c0_i32 : i32
    %1 = arith.extui %0 : i1 to i32
    %c0_i32_0 = arith.constant 0 : i32
    %2 = arith.cmpi ne, %1, %c0_i32_0 : i32
    scf.if %2 {
      %c0_76 = arith.constant 0 : index
      %c0_77 = arith.constant 0 : index
      %c0_78 = arith.constant 0 : index
      %120 = vector.load %arg2[%c0_76, %c0_77, %c0_78] : memref<1x8x32xf32, #tpu.memory_space<vmem>>, vector<1x8x32xf32>
      %121 = vector.shape_cast %120 : vector<1x8x32xf32> to vector<8x32xf32>
      %c0_79 = arith.constant 0 : index
      %c0_80 = arith.constant 0 : index
      %c0_81 = arith.constant 0 : index
      %122 = vector.load %arg4[%c0_79, %c0_80, %c0_81] : memref<2x32x16xf32, #tpu.memory_space<vmem>>, vector<1x32x16xf32>
      %123 = vector.shape_cast %122 : vector<1x32x16xf32> to vector<32x16xf32>
      %cst_82 = arith.constant dense<0.000000e+00> : vector<8x16xf32>
      %124 = tpu.matmul %121, %123, %cst_82 {dimension_numbers = #tpu.dot_dimension_numbers<[1], [0], [0], [1], [0, 0, 1, 1], [], []>} : vector<8x32xf32>, vector<32x16xf32>, vector<8x16xf32> -> vector<8x16xf32>
      %c0_83 = arith.constant 0 : index
      %c0_84 = arith.constant 0 : index
      %c0_85 = arith.constant 0 : index
      %125 = vector.load %arg17[%c0_83, %c0_84, %c0_85] : memref<2x8x16xf32, #tpu.memory_space<vmem>>, vector<1x8x16xf32>
      %126 = vector.shape_cast %125 : vector<1x8x16xf32> to vector<8x16xf32>
      %127 = vector.shape_cast %124 : vector<8x16xf32> to vector<1x8x16xf32>
      tpu.vector_store %arg17[%c0_83, %c0_84, %c0_85], %127 {strides = array<i32>} : memref<2x8x16xf32, #tpu.memory_space<vmem>>, vector<1x8x16xf32>,
      %c0_86 = arith.constant 0 : index
      %c0_87 = arith.constant 0 : index
      %c0_88 = arith.constant 0 : index
      %128 = vector.load %arg5[%c0_86, %c0_87, %c0_88] : memref<2x32x16xf32, #tpu.memory_space<vmem>>, vector<1x32x16xf32>
      %129 = vector.shape_cast %128 : vector<1x32x16xf32> to vector<32x16xf32>
      %cst_89 = arith.constant dense<0.000000e+00> : vector<8x16xf32>
      %130 = tpu.matmul %121, %129, %cst_89 {dimension_numbers = #tpu.dot_dimension_numbers<[1], [0], [0], [1], [0, 0, 1, 1], [], []>} : vector<8x32xf32>, vector<32x16xf32>, vector<8x16xf32> -> vector<8x16xf32>
      %c0_90 = arith.constant 0 : index
      %c0_91 = arith.constant 0 : index
      %c0_92 = arith.constant 0 : index
      %131 = vector.load %arg18[%c0_90, %c0_91, %c0_92] : memref<2x8x16xf32, #tpu.memory_space<vmem>>, vector<1x8x16xf32>
      %132 = vector.shape_cast %131 : vector<1x8x16xf32> to vector<8x16xf32>
      %133 = vector.shape_cast %130 : vector<8x16xf32> to vector<1x8x16xf32>
      tpu.vector_store %arg18[%c0_90, %c0_91, %c0_92], %133 {strides = array<i32>} : memref<2x8x16xf32, #tpu.memory_space<vmem>>, vector<1x8x16xf32>,
      %c1_93 = arith.constant 1 : index
      %c0_94 = arith.constant 0 : index
      %c0_95 = arith.constant 0 : index
      %134 = vector.load %arg4[%c1_93, %c0_94, %c0_95] : memref<2x32x16xf32, #tpu.memory_space<vmem>>, vector<1x32x16xf32>
      %135 = vector.shape_cast %134 : vector<1x32x16xf32> to vector<32x16xf32>
      %cst_96 = arith.constant dense<0.000000e+00> : vector<8x16xf32>
      %136 = tpu.matmul %121, %135, %cst_96 {dimension_numbers = #tpu.dot_dimension_numbers<[1], [0], [0], [1], [0, 0, 1, 1], [], []>} : vector<8x32xf32>, vector<32x16xf32>, vector<8x16xf32> -> vector<8x16xf32>
      %c1_97 = arith.constant 1 : index
      %c0_98 = arith.constant 0 : index
      %c0_99 = arith.constant 0 : index
      %137 = vector.load %arg17[%c1_97, %c0_98, %c0_99] : memref<2x8x16xf32, #tpu.memory_space<vmem>>, vector<1x8x16xf32>
      %138 = vector.shape_cast %137 : vector<1x8x16xf32> to vector<8x16xf32>
      %139 = vector.shape_cast %136 : vector<8x16xf32> to vector<1x8x16xf32>
      tpu.vector_store %arg17[%c1_97, %c0_98, %c0_99], %139 {strides = array<i32>} : memref<2x8x16xf32, #tpu.memory_space<vmem>>, vector<1x8x16xf32>,
      %c1_100 = arith.constant 1 : index
      %c0_101 = arith.constant 0 : index
      %c0_102 = arith.constant 0 : index
      %140 = vector.load %arg5[%c1_100, %c0_101, %c0_102] : memref<2x32x16xf32, #tpu.memory_space<vmem>>, vector<1x32x16xf32>
      %141 = vector.shape_cast %140 : vector<1x32x16xf32> to vector<32x16xf32>
      %cst_103 = arith.constant dense<0.000000e+00> : vector<8x16xf32>
      %142 = tpu.matmul %121, %141, %cst_103 {dimension_numbers = #tpu.dot_dimension_numbers<[1], [0], [0], [1], [0, 0, 1, 1], [], []>} : vector<8x32xf32>, vector<32x16xf32>, vector<8x16xf32> -> vector<8x16xf32>
      %c1_104 = arith.constant 1 : index
      %c0_105 = arith.constant 0 : index
      %c0_106 = arith.constant 0 : index
      %143 = vector.load %arg18[%c1_104, %c0_105, %c0_106] : memref<2x8x16xf32, #tpu.memory_space<vmem>>, vector<1x8x16xf32>
      %144 = vector.shape_cast %143 : vector<1x8x16xf32> to vector<8x16xf32>
      %145 = vector.shape_cast %142 : vector<8x16xf32> to vector<1x8x16xf32>
      tpu.vector_store %arg18[%c1_104, %c0_105, %c0_106], %145 {strides = array<i32>} : memref<2x8x16xf32, #tpu.memory_space<vmem>>, vector<1x8x16xf32>,
    } else {
    }
    %c8_i32 = arith.constant 8 : i32
    %3 = arith.muli %arg1, %c8_i32 : i32
    %4 = tpu.assume_multiple %3, 8 : i32
    %c0 = arith.constant 0 : index
    %5 = arith.index_cast %4 : i32 to index
    %c0_1 = arith.constant 0 : index
    %6 = vector.load %arg2[%c0, %5, %c0_1] : memref<1x8x32xf32, #tpu.memory_space<vmem>>, vector<1x8x32xf32>
    %7 = vector.shape_cast %6 : vector<1x8x32xf32> to vector<8x32xf32>
    %c0_2 = arith.constant 0 : index
    %c0_3 = arith.constant 0 : index
    %c0_4 = arith.constant 0 : index
    %8 = vector.load %arg3[%c0_2, %c0_3, %c0_4] : memref<2x32x16xf32, #tpu.memory_space<vmem>>, vector<1x32x16xf32>
    %9 = vector.shape_cast %8 : vector<1x32x16xf32> to vector<32x16xf32>
    %cst = arith.constant dense<0.000000e+00> : vector<8x16xf32>
    %10 = tpu.matmul %7, %9, %cst {dimension_numbers = #tpu.dot_dimension_numbers<[1], [0], [0], [1], [0, 0, 1, 1], [], []>} : vector<8x32xf32>, vector<32x16xf32>, vector<8x16xf32> -> vector<8x16xf32>
    %c0_5 = arith.constant 0 : index
    %c0_6 = arith.constant 0 : index
    %c0_7 = arith.constant 0 : index
    %11 = vector.load %arg17[%c0_5, %c0_6, %c0_7] : memref<2x8x16xf32, #tpu.memory_space<vmem>>, vector<1x8x16xf32>
    %12 = vector.shape_cast %11 : vector<1x8x16xf32> to vector<8x16xf32>
    %cst_8 = arith.constant dense<0.000000e+00> : vector<8x8xf32>
    %13 = tpu.matmul %10, %12, %cst_8 {dimension_numbers = #tpu.dot_dimension_numbers<[1], [1], [0], [0], [0, 0, 1, 0], [], []>} : vector<8x16xf32>, vector<8x16xf32>, vector<8x8xf32> -> vector<8x8xf32>
    %cst_9 = arith.constant dense<0xFF800000> : vector<8xf32>
    %14 = vector.multi_reduction <maximumf>, %13, %cst_9 [1] : vector<8x8xf32> to vector<8xf32>
    %15 = vector.shape_cast %14 : vector<8xf32> to vector<8x1xf32>
    %16 = vector.broadcast %15 : vector<8x1xf32> to vector<8x8xf32>
    %17 = arith.subf %13, %16 : vector<8x8xf32>
    %18 = math.exp %17 : vector<8x8xf32>
    %cst_10 = arith.constant dense<0.000000e+00> : vector<8xf32>
    %19 = vector.multi_reduction <add>, %18, %cst_10 [1] : vector<8x8xf32> to vector<8xf32>
    %20 = vector.shape_cast %19 : vector<8xf32> to vector<8x1xf32>
    %21 = vector.broadcast %20 : vector<8x1xf32> to vector<8x8xf32>
    %22 = arith.divf %18, %21 : vector<8x8xf32>
    %c0_11 = arith.constant 0 : index
    %c0_12 = arith.constant 0 : index
    %c0_13 = arith.constant 0 : index
    %c0_14 = arith.constant 0 : index
    %23 = vector.load %arg16[%c0_11, %c0_12, %c0_13, %c0_14] : memref<1x2x8x8xf32, #tpu.memory_space<vmem>>, vector<1x1x8x8xf32>
    %24 = vector.shape_cast %23 : vector<1x1x8x8xf32> to vector<8x8xf32>
    %25 = vector.shape_cast %22 : vector<8x8xf32> to vector<1x1x8x8xf32>
    tpu.vector_store %arg16[%c0_11, %c0_12, %c0_13, %c0_14], %25 {strides = array<i32>} : memref<1x2x8x8xf32, #tpu.memory_space<vmem>>, vector<1x1x8x8xf32>,
    %c0_15 = arith.constant 0 : index
    %c0_16 = arith.constant 0 : index
    %c0_17 = arith.constant 0 : index
    %26 = vector.load %arg18[%c0_15, %c0_16, %c0_17] : memref<2x8x16xf32, #tpu.memory_space<vmem>>, vector<1x8x16xf32>
    %27 = vector.shape_cast %26 : vector<1x8x16xf32> to vector<8x16xf32>
    %cst_18 = arith.constant dense<0.000000e+00> : vector<8x16xf32>
    %28 = tpu.matmul %22, %27, %cst_18 {dimension_numbers = #tpu.dot_dimension_numbers<[1], [0], [0], [1], [0, 0, 1, 1], [], []>} : vector<8x8xf32>, vector<8x16xf32>, vector<8x16xf32> -> vector<8x16xf32>
    %c0_19 = arith.constant 0 : index
    %c0_20 = arith.constant 0 : index
    %29 = vector.load %arg19[%c0_19, %c0_20] : memref<8x32xf32, #tpu.memory_space<vmem>>, vector<8x16xf32>
    tpu.vector_store %arg19[%c0_19, %c0_20], %28 {strides = array<i32>} : memref<8x32xf32, #tpu.memory_space<vmem>>, vector<8x16xf32>,
    %c1 = arith.constant 1 : index
    %c0_21 = arith.constant 0 : index
    %c0_22 = arith.constant 0 : index
    %30 = vector.load %arg3[%c1, %c0_21, %c0_22] : memref<2x32x16xf32, #tpu.memory_space<vmem>>, vector<1x32x16xf32>
    %31 = vector.shape_cast %30 : vector<1x32x16xf32> to vector<32x16xf32>
    %cst_23 = arith.constant dense<0.000000e+00> : vector<8x16xf32>
    %32 = tpu.matmul %7, %31, %cst_23 {dimension_numbers = #tpu.dot_dimension_numbers<[1], [0], [0], [1], [0, 0, 1, 1], [], []>} : vector<8x32xf32>, vector<32x16xf32>, vector<8x16xf32> -> vector<8x16xf32>
    %c1_24 = arith.constant 1 : index
    %c0_25 = arith.constant 0 : index
    %c0_26 = arith.constant 0 : index
    %33 = vector.load %arg17[%c1_24, %c0_25, %c0_26] : memref<2x8x16xf32, #tpu.memory_space<vmem>>, vector<1x8x16xf32>
    %34 = vector.shape_cast %33 : vector<1x8x16xf32> to vector<8x16xf32>
    %cst_27 = arith.constant dense<0.000000e+00> : vector<8x8xf32>
    %35 = tpu.matmul %32, %34, %cst_27 {dimension_numbers = #tpu.dot_dimension_numbers<[1], [1], [0], [0], [0, 0, 1, 0], [], []>} : vector<8x16xf32>, vector<8x16xf32>, vector<8x8xf32> -> vector<8x8xf32>
    %cst_28 = arith.constant dense<0xFF800000> : vector<8xf32>
    %36 = vector.multi_reduction <maximumf>, %35, %cst_28 [1] : vector<8x8xf32> to vector<8xf32>
    %37 = vector.shape_cast %36 : vector<8xf32> to vector<8x1xf32>
    %38 = vector.broadcast %37 : vector<8x1xf32> to vector<8x8xf32>
    %39 = arith.subf %35, %38 : vector<8x8xf32>
    %40 = math.exp %39 : vector<8x8xf32>
    %cst_29 = arith.constant dense<0.000000e+00> : vector<8xf32>
    %41 = vector.multi_reduction <add>, %40, %cst_29 [1] : vector<8x8xf32> to vector<8xf32>
    %42 = vector.shape_cast %41 : vector<8xf32> to vector<8x1xf32>
    %43 = vector.broadcast %42 : vector<8x1xf32> to vector<8x8xf32>
    %44 = arith.divf %40, %43 : vector<8x8xf32>
    %c0_30 = arith.constant 0 : index
    %c1_31 = arith.constant 1 : index
    %c0_32 = arith.constant 0 : index
    %c0_33 = arith.constant 0 : index
    %45 = vector.load %arg16[%c0_30, %c1_31, %c0_32, %c0_33] : memref<1x2x8x8xf32, #tpu.memory_space<vmem>>, vector<1x1x8x8xf32>
    %46 = vector.shape_cast %45 : vector<1x1x8x8xf32> to vector<8x8xf32>
    %47 = vector.shape_cast %44 : vector<8x8xf32> to vector<1x1x8x8xf32>
    tpu.vector_store %arg16[%c0_30, %c1_31, %c0_32, %c0_33], %47 {strides = array<i32>} : memref<1x2x8x8xf32, #tpu.memory_space<vmem>>, vector<1x1x8x8xf32>,
    %c1_34 = arith.constant 1 : index
    %c0_35 = arith.constant 0 : index
    %c0_36 = arith.constant 0 : index
    %48 = vector.load %arg18[%c1_34, %c0_35, %c0_36] : memref<2x8x16xf32, #tpu.memory_space<vmem>>, vector<1x8x16xf32>
    %49 = vector.shape_cast %48 : vector<1x8x16xf32> to vector<8x16xf32>
    %cst_37 = arith.constant dense<0.000000e+00> : vector<8x16xf32>
    %50 = tpu.matmul %44, %49, %cst_37 {dimension_numbers = #tpu.dot_dimension_numbers<[1], [0], [0], [1], [0, 0, 1, 1], [], []>} : vector<8x8xf32>, vector<8x16xf32>, vector<8x16xf32> -> vector<8x16xf32>
    %c0_38 = arith.constant 0 : index
    %c16 = arith.constant 16 : index
    %51 = vector.load %arg19[%c0_38, %c16] : memref<8x32xf32, #tpu.memory_space<vmem>>, vector<8x16xf32>
    tpu.vector_store %arg19[%c0_38, %c16], %50 {strides = array<i32>} : memref<8x32xf32, #tpu.memory_space<vmem>>, vector<8x16xf32>,
    %c0_39 = arith.constant 0 : index
    %c0_40 = arith.constant 0 : index
    %52 = vector.load %arg19[%c0_39, %c0_40] : memref<8x32xf32, #tpu.memory_space<vmem>>, vector<8x32xf32>
    %c0_41 = arith.constant 0 : index
    %c0_42 = arith.constant 0 : index
    %53 = vector.load %arg6[%c0_41, %c0_42] : memref<32x32xf32, #tpu.memory_space<vmem>>, vector<32x32xf32>
    %cst_43 = arith.constant dense<0.000000e+00> : vector<8x32xf32>
    %54 = tpu.matmul %52, %53, %cst_43 {dimension_numbers = #tpu.dot_dimension_numbers<[1], [0], [0], [1], [0, 0, 1, 1], [], []>} : vector<8x32xf32>, vector<32x32xf32>, vector<8x32xf32> -> vector<8x32xf32>
    %55 = arith.addf %54, %7 : vector<8x32xf32>
    %c0_44 = arith.constant 0 : index
    %c0_45 = arith.constant 0 : index
    %56 = vector.load %arg7[%c0_44, %c0_45] : memref<1x32xf32, #tpu.memory_space<vmem>>, vector<1x32xf32>
    %c0_46 = arith.constant 0 : index
    %c0_47 = arith.constant 0 : index
    %57 = vector.load %arg8[%c0_46, %c0_47] : memref<1x32xf32, #tpu.memory_space<vmem>>, vector<1x32xf32>
    %cst_48 = arith.constant dense<0.000000e+00> : vector<8xf32>
    %58 = vector.multi_reduction <add>, %55, %cst_48 [1] : vector<8x32xf32> to vector<8xf32>
    %59 = vector.shape_cast %58 : vector<8xf32> to vector<8x1xf32>
    %cst_49 = arith.constant 3.200000e+01 : f32
    %60 = vector.broadcast %cst_49 : f32 to vector<8x1xf32>
    %61 = arith.divf %59, %60 : vector<8x1xf32>
    %62 = vector.broadcast %61 : vector<8x1xf32> to vector<8x32xf32>
    %63 = arith.subf %55, %62 : vector<8x32xf32>
    %64 = arith.mulf %63, %63 : vector<8x32xf32>
    %cst_50 = arith.constant dense<0.000000e+00> : vector<8xf32>
    %65 = vector.multi_reduction <add>, %64, %cst_50 [1] : vector<8x32xf32> to vector<8xf32>
    %66 = vector.shape_cast %65 : vector<8xf32> to vector<8x1xf32>
    %cst_51 = arith.constant 3.200000e+01 : f32
    %67 = vector.broadcast %cst_51 : f32 to vector<8x1xf32>
    %68 = arith.divf %66, %67 : vector<8x1xf32>
    %69 = vector.broadcast %61 : vector<8x1xf32> to vector<8x32xf32>
    %70 = arith.subf %55, %69 : vector<8x32xf32>
    %cst_52 = arith.constant 9.99999997E-7 : f32
    %71 = vector.broadcast %cst_52 : f32 to vector<8x1xf32>
    %72 = arith.addf %68, %71 : vector<8x1xf32>
    %73 = math.rsqrt %72 : vector<8x1xf32>
    %74 = vector.broadcast %73 : vector<8x1xf32> to vector<8x32xf32>
    %75 = arith.mulf %70, %74 : vector<8x32xf32>
    %76 = vector.broadcast %56 : vector<1x32xf32> to vector<8x32xf32>
    %77 = arith.mulf %75, %76 : vector<8x32xf32>
    %78 = vector.broadcast %57 : vector<1x32xf32> to vector<8x32xf32>
    %79 = arith.addf %77, %78 : vector<8x32xf32>
    %c0_53 = arith.constant 0 : index
    %c0_54 = arith.constant 0 : index
    %80 = vector.load %arg9[%c0_53, %c0_54] : memref<32x64xf32, #tpu.memory_space<vmem>>, vector<32x64xf32>
    %cst_55 = arith.constant dense<0.000000e+00> : vector<8x64xf32>
    %81 = tpu.matmul %79, %80, %cst_55 {dimension_numbers = #tpu.dot_dimension_numbers<[1], [0], [0], [1], [0, 0, 1, 1], [], []>} : vector<8x32xf32>, vector<32x64xf32>, vector<8x64xf32> -> vector<8x64xf32>
    %c0_56 = arith.constant 0 : index
    %c0_57 = arith.constant 0 : index
    %82 = vector.load %arg10[%c0_56, %c0_57] : memref<1x64xf32, #tpu.memory_space<vmem>>, vector<1x64xf32>
    %83 = vector.broadcast %82 : vector<1x64xf32> to vector<8x64xf32>
    %84 = arith.addf %81, %83 : vector<8x64xf32>
    %cst_58 = arith.constant 0.000000e+00 : f32
    %85 = vector.broadcast %cst_58 : f32 to vector<8x64xf32>
    %86 = arith.maximumf %84, %85 : vector<8x64xf32>
    %c0_59 = arith.constant 0 : index
    %c0_60 = arith.constant 0 : index
    %87 = vector.load %arg11[%c0_59, %c0_60] : memref<64x32xf32, #tpu.memory_space<vmem>>, vector<64x32xf32>
    %cst_61 = arith.constant dense<0.000000e+00> : vector<8x32xf32>
    %88 = tpu.matmul %86, %87, %cst_61 {dimension_numbers = #tpu.dot_dimension_numbers<[1], [0], [0], [1], [0, 0, 1, 1], [], []>} : vector<8x64xf32>, vector<64x32xf32>, vector<8x32xf32> -> vector<8x32xf32>
    %c0_62 = arith.constant 0 : index
    %c0_63 = arith.constant 0 : index
    %89 = vector.load %arg12[%c0_62, %c0_63] : memref<1x32xf32, #tpu.memory_space<vmem>>, vector<1x32xf32>
    %90 = vector.broadcast %89 : vector<1x32xf32> to vector<8x32xf32>
    %91 = arith.addf %88, %90 : vector<8x32xf32>
    %92 = arith.addf %91, %79 : vector<8x32xf32>
    %c0_64 = arith.constant 0 : index
    %c0_65 = arith.constant 0 : index
    %93 = vector.load %arg13[%c0_64, %c0_65] : memref<1x32xf32, #tpu.memory_space<vmem>>, vector<1x32xf32>
    %c0_66 = arith.constant 0 : index
    %c0_67 = arith.constant 0 : index
    %94 = vector.load %arg14[%c0_66, %c0_67] : memref<1x32xf32, #tpu.memory_space<vmem>>, vector<1x32xf32>
    %cst_68 = arith.constant dense<0.000000e+00> : vector<8xf32>
    %95 = vector.multi_reduction <add>, %92, %cst_68 [1] : vector<8x32xf32> to vector<8xf32>
    %96 = vector.shape_cast %95 : vector<8xf32> to vector<8x1xf32>
    %cst_69 = arith.constant 3.200000e+01 : f32
    %97 = vector.broadcast %cst_69 : f32 to vector<8x1xf32>
    %98 = arith.divf %96, %97 : vector<8x1xf32>
    %99 = vector.broadcast %98 : vector<8x1xf32> to vector<8x32xf32>
    %100 = arith.subf %92, %99 : vector<8x32xf32>
    %101 = arith.mulf %100, %100 : vector<8x32xf32>
    %cst_70 = arith.constant dense<0.000000e+00> : vector<8xf32>
    %102 = vector.multi_reduction <add>, %101, %cst_70 [1] : vector<8x32xf32> to vector<8xf32>
    %103 = vector.shape_cast %102 : vector<8xf32> to vector<8x1xf32>
    %cst_71 = arith.constant 3.200000e+01 : f32
    %104 = vector.broadcast %cst_71 : f32 to vector<8x1xf32>
    %105 = arith.divf %103, %104 : vector<8x1xf32>
    %106 = vector.broadcast %98 : vector<8x1xf32> to vector<8x32xf32>
    %107 = arith.subf %92, %106 : vector<8x32xf32>
    %cst_72 = arith.constant 9.99999997E-7 : f32
    %108 = vector.broadcast %cst_72 : f32 to vector<8x1xf32>
    %109 = arith.addf %105, %108 : vector<8x1xf32>
    %110 = math.rsqrt %109 : vector<8x1xf32>
    %111 = vector.broadcast %110 : vector<8x1xf32> to vector<8x32xf32>
    %112 = arith.mulf %107, %111 : vector<8x32xf32>
    %113 = vector.broadcast %93 : vector<1x32xf32> to vector<8x32xf32>
    %114 = arith.mulf %112, %113 : vector<8x32xf32>
    %115 = vector.broadcast %94 : vector<1x32xf32> to vector<8x32xf32>
    %116 = arith.addf %114, %115 : vector<8x32xf32>
    %c0_73 = arith.constant 0 : index
    %c0_74 = arith.constant 0 : index
    %c0_75 = arith.constant 0 : index
    %117 = vector.load %arg15[%c0_73, %c0_74, %c0_75] : memref<1x8x32xf32, #tpu.memory_space<vmem>>, vector<1x8x32xf32>
    %118 = vector.shape_cast %117 : vector<1x8x32xf32> to vector<8x32xf32>
    %119 = vector.shape_cast %116 : vector<8x32xf32> to vector<1x8x32xf32>
    tpu.vector_store %arg15[%c0_73, %c0_74, %c0_75], %119 {strides = array<i32>} : memref<1x8x32xf32, #tpu.memory_space<vmem>>, vector<1x8x32xf32>,
    return
  }
  func.func @transform_0(%arg0: i32, %arg1: i32) -> (i32, i32, i32) {
    %c0_i32 = arith.constant 0 : i32
    %c0_i32_0 = arith.constant 0 : i32
    %c0_i32_1 = arith.constant 0 : i32
    return %arg0, %c0_i32, %c0_i32_0 : i32, i32, i32
  }
  func.func @transform_1(%arg0: i32, %arg1: i32) -> (i32, i32, i32) {
    %c0_i32 = arith.constant 0 : i32
    %c0_i32_0 = arith.constant 0 : i32
    %c0_i32_1 = arith.constant 0 : i32
    %c0_i32_2 = arith.constant 0 : i32
    return %c0_i32, %c0_i32_0, %c0_i32_1 : i32, i32, i32
  }
  func.func @transform_2(%arg0: i32, %arg1: i32) -> (i32, i32, i32) {
    %c0_i32 = arith.constant 0 : i32
    %c0_i32_0 = arith.constant 0 : i32
    %c0_i32_1 = arith.constant 0 : i32
    %c0_i32_2 = arith.constant 0 : i32
    return %c0_i32, %c0_i32_0, %c0_i32_1 : i32, i32, i32
  }
  func.func @transform_3(%arg0: i32, %arg1: i32) -> (i32, i32, i32) {
    %c0_i32 = arith.constant 0 : i32
    %c0_i32_0 = arith.constant 0 : i32
    %c0_i32_1 = arith.constant 0 : i32
    %c0_i32_2 = arith.constant 0 : i32
    return %c0_i32, %c0_i32_0, %c0_i32_1 : i32, i32, i32
  }
  func.func @transform_4(%arg0: i32, %arg1: i32) -> (i32, i32) {
    %c0_i32 = arith.constant 0 : i32
    %c0_i32_0 = arith.constant 0 : i32
    %c0_i32_1 = arith.constant 0 : i32
    return %c0_i32, %c0_i32_0 : i32, i32
  }
  func.func @transform_5(%arg0: i32, %arg1: i32) -> (i32, i32) {
    %c0_i32 = arith.constant 0 : i32
    %c0_i32_0 = arith.constant 0 : i32
    %c0_i32_1 = arith.constant 0 : i32
    return %c0_i32, %c0_i32_0 : i32, i32
  }
  func.func @transform_6(%arg0: i32, %arg1: i32) -> (i32, i32) {
    %c0_i32 = arith.constant 0 : i32
    %c0_i32_0 = arith.constant 0 : i32
    %c0_i32_1 = arith.constant 0 : i32
    return %c0_i32, %c0_i32_0 : i32, i32
  }
  func.func @transform_7(%arg0: i32, %arg1: i32) -> (i32, i32) {
    %c0_i32 = arith.constant 0 : i32
    %c0_i32_0 = arith.constant 0 : i32
    %c0_i32_1 = arith.constant 0 : i32
    return %c0_i32, %c0_i32_0 : i32, i32
  }
  func.func @transform_8(%arg0: i32, %arg1: i32) -> (i32, i32) {
    %c0_i32 = arith.constant 0 : i32
    %c0_i32_0 = arith.constant 0 : i32
    %c0_i32_1 = arith.constant 0 : i32
    return %c0_i32, %c0_i32_0 : i32, i32
  }
  func.func @transform_9(%arg0: i32, %arg1: i32) -> (i32, i32) {
    %c0_i32 = arith.constant 0 : i32
    %c0_i32_0 = arith.constant 0 : i32
    %c0_i32_1 = arith.constant 0 : i32
    return %c0_i32, %c0_i32_0 : i32, i32
  }
  func.func @transform_10(%arg0: i32, %arg1: i32) -> (i32, i32) {
    %c0_i32 = arith.constant 0 : i32
    %c0_i32_0 = arith.constant 0 : i32
    %c0_i32_1 = arith.constant 0 : i32
    return %c0_i32, %c0_i32_0 : i32, i32
  }
  func.func @transform_11(%arg0: i32, %arg1: i32) -> (i32, i32) {
    %c0_i32 = arith.constant 0 : i32
    %c0_i32_0 = arith.constant 0 : i32
    %c0_i32_1 = arith.constant 0 : i32
    return %c0_i32, %c0_i32_0 : i32, i32
  }
  func.func @transform_12(%arg0: i32, %arg1: i32) -> (i32, i32) {
    %c0_i32 = arith.constant 0 : i32
    %c0_i32_0 = arith.constant 0 : i32
    %c0_i32_1 = arith.constant 0 : i32
    return %c0_i32, %c0_i32_0 : i32, i32
  }
  func.func @transform_13(%arg0: i32, %arg1: i32) -> (i32, i32, i32) {
    %c0_i32 = arith.constant 0 : i32
    %c0_i32_0 = arith.constant 0 : i32
    return %arg0, %arg1, %c0_i32 : i32, i32, i32
  }
  func.func @transform_14(%arg0: i32, %arg1: i32) -> (i32, i32, i32, i32) {
    %c0_i32 = arith.constant 0 : i32
    %c0_i32_0 = arith.constant 0 : i32
    %c0_i32_1 = arith.constant 0 : i32
    return %arg0, %c0_i32, %arg1, %c0_i32_0 : i32, i32, i32, i32
  }
}

</mosaic_0001>

<bundles_post_ra>
// kernel: tpu_custom_call.1
= control target key start
LH: loop header
LB: loop body
LE: loop exit
PB: predicated region body
PF: predicated region fallthrough
CT: control target
= control target key end

     0   :  { %s1762_s0 = inlined_call_operand.vmem [shape: f32[2,8,32], index: 0, kind: input, shape index: {}]   ;;  %s1763_s1 = inlined_call_operand.vmem [shape: f32[2,32,16], index: 1, kind: input, shape index: {}]   ;;  %s1764_s2 = inlined_call_operand.vmem [shape: f32[2,32,16], index: 2, kind: input, shape index: {}]   ;;  %s1765_s3 = inlined_call_operand.vmem [shape: f32[2,32,16], index: 3, kind: input, shape index: {}]   ;;  %s1766_s4 = inlined_call_operand.vmem [shape: f32[32,32], index: 4, kind: input, shape index: {}]   ;;  %s1767_s5 = inlined_call_operand.vmem [shape: f32[1,32], index: 5, kind: input, shape index: {}]   ;;  %s1768_s6 = inlined_call_operand.vmem [shape: f32[1,32], index: 6, kind: input, shape index: {}]   ;;  %s1769_s7 = inlined_call_operand.vmem [shape: f32[32,64], index: 7, kind: input, shape index: {}]   ;;  %s1770_s8 = inlined_call_operand.vmem [shape: f32[1,64], index: 8, kind: input, shape index: {}]   ;;  %s1771_s9 = inlined_call_operand.vmem [shape: f32[64,32], index: 9, kind: input, shape index: {}]   ;;  %s1772_s10 = inlined_call_operand.vmem [shape: f32[1,32], index: 10, kind: input, shape index: {}]   ;;  %s1773_s11 = inlined_call_operand.vmem [shape: f32[1,32], index: 11, kind: input, shape index: {}]   ;;  %s1774_s12 = inlined_call_operand.vmem [shape: f32[1,32], index: 12, kind: input, shape index: {}]   ;;  %s1775_s13 = inlined_call_operand.hbm [shape: f32[2,8,32], index: 13, kind: output, shape index: {0}]   ;;  %s1776_s14 = inlined_call_operand.hbm [shape: f32[2,2,8,8], index: 14, kind: output, shape index: {1}]  }
   0x1   :  { %1782 = sst [smem:[#allocation17_spill]] %s1762_s0 }
   0x2   :  { %1783 = sst [smem:[#allocation18_spill]] %s1763_s1 }
   0x3   :  { %1784 = sst [smem:[#allocation19_spill]] %s1764_s2 }
   0x4   :  { %1785 = sst [smem:[#allocation20_spill]] %s1765_s3 }
   0x5   :  { %20 = vsyncpa [#allocation6], 0 }
   0x6   :  { %22 = vsyncpa [#allocation6 + $0x1], 0 }
   0x7   :  { %23 = vsyncpa [#allocation8], 0 }
   0x8   :  { %25 = vsyncpa [#allocation8 + $0x1], 0  ;;  %s1457_s29 = smov 0   ;;  %s1459_s30 = smov 0  }
   0x9   :  { %s1461_s15 = smov 0   ;;  %s1463_s16 = smov 0  }
   0xa   :  { %s1465_s17 = smov 0   ;;  %s1467_s18 = smov 0  }
   0xb LB: > { %1786 = sst [smem:[#allocation11_spill]] %s1356_s29  ;;  %s1138_s19 = sadd.s32 4294967295, %s1376_s18   ;;  %s1376_s18 = sphi %s1467_s18, %s31_s18   ;;  %s1372_s17 = sphi %s1465_s17, %s1803_s17   ;;  %s1368_s16 = sphi %s1463_s16, %s1802_s16   ;;  %s1364_s15 = sphi %s1461_s15, %s1801_s15   ;;  %s1360_s30 = sphi %s1459_s30, %s1805_s30   ;;  %s1356_s29 = sphi %s1457_s29, %s1804_s29  }
   0xc   : > { %1787 = sst [smem:[#allocation12_spill]] %s1364_s15  ;;  %s1139_s20 = sadd.s32 4294967294, %s1376_s18  }
   0xd   : > { %1788 = sst [smem:[#allocation13_spill]] %s1372_s17  ;;  %s43_s21 = sadd.s32 1, %s1372_s17 }
   0xe   : > { %s330_s22 = sadd.s32 1, %s1364_s15  ;;  %p45_p0 = scmp.ge.s32.totalorder %s43_s21, 2 }
   0xf   : > { %p340_p1 = scmp.ne.s32.totalorder %s1364_s15, %s1360_s30  ;;  %p341_p2 = scmp.eq.s32.totalorder %s1138_s19, 1 }
  0x10   : > { %p346_p3 = scmp.ne.s32.totalorder %s1360_s30, %s1356_s29  ;;  %s1807_s21 = smov (%p45_p0, %s43_s21), 0 }
  0x11   : > { %1789 = sst [smem:[#allocation14_spill]] %s1807_s21  ;;  %p1497_p4 = por %p341_p2, %p340_p1 }
  0x12   : > { %p347_p5 = scmp.eq.s32.totalorder %s1139_s20, 1  ;;  %s325_s24 = ssub.s32 %s1372_s17, %s1807_s21 }
  0x13   : > { %p1142_p6 = scmp.ge.s32.totalorder %s1376_s18, 1  ;;  %p328_p7 = scmp.eq.s32.totalorder %s325_s24, 0 }
  0x14   : > { %p1504_p8 = por %p347_p5, %p346_p3  ;;  %p436_p9 = scmp.lt.s32.totalorder %s1376_s18, 3 }
  0x15   : > { %s1510_s26 = scalar_select %p328_p7, %s1364_s15, %s330_s22  }
  0x16   : > { %s1791_s25 = scalar_select %p1504_p8, 1, 0 }
  0x17   : > { %1793 = sst [smem:[#allocation16_spill]] %s1510_s26  ;;  %p437_p10 = pnand %p1142_p6, %p436_p9 }
  0x18   : > { %1792 = sst [smem:[#allocation15_spill]] %s1791_s25  ;;  %p486_p11 = scmp.lt.s32.totalorder (!%p437_p10), %s1368_s16, 1 }
  0x19   : > { %440 = sbr.rel (%p437_p10) target bundleno = 1736 (0x6c8), region = 72  ;;  %s1794_s2 = sld [smem:[#allocation19_spill]] (!%p437_p10) }
  0x1a   : > { %s1795_s3 = sld [smem:[#allocation20_spill]] (!%p437_p10)  ;;  %s1378_s27 = smov (!%p437_p10), 16  }
  0x1b   : > { %s1796_s0 = sld [smem:[#allocation17_spill]] (!%p437_p10) }
  0x1c   : > { %s1797_s1 = sld [smem:[#allocation18_spill]] (!%p437_p10) }
  0x1e   : > { %s487_s28 = scalar_select %p486_p11, %s1368_s16, 1  ;;  %vm499_vm0 = vcmask 261120   ;;  %vm523_vm1 = vcmask 130048   ;;  %vm663_vm2 = vcmask 64512   ;;  %vm822_vm11 = vcmask 261248  }
  0x1f   : > { %v1151_v0 = vld [vmem:[%s1794_s2 + $0x38] sm:$0xff]  ;;  %v1150_v1 = vld [vmem:[%s1794_s2 + $0x30] sm:$0xff]  ;;  %v1149_v4 = vld [vmem:[%s1794_s2 + $0x28] sm:$0xff] }
  0x20   : > { %v1156_v2 = vld [vmem:[%s1795_s3 + $0x38] sm:$0xff]  ;;  %567 = vmatpush.msra.mxu2 %v1151_v0  ;;  %v1155_v3 = vld [vmem:[%s1795_s3 + $0x30] sm:$0xff]  ;;  %v1154_v5 = vld [vmem:[%s1795_s3 + $0x28] sm:$0xff]  ;;  %s1145_s26 = sshll.u32 %s487_s28, 3  ;;  %s1616_s28 = sand.u32 1, %s1360_s30  }
  0x21   : > { %594 = vmatpush.msra.mxu3 %v1156_v2  ;;  %v498_v6 = vld [vmem:[%s1794_s2 + $0x18] sm:$0xff]  ;;  %v497_v7 = vld [vmem:[%s1794_s2 + $0x10] sm:$0xff]  ;;  %v1148_v8 = vld [vmem:[%s1794_s2 + $0x20] sm:$0xff]  ;;  %s489_s21 = scalar_lea.vmem %s1796_s0, %s1145_s26  ;;  %s1144_s22 = sshll.u32 %s1616_s28, 4 }
  0x22   : > { %568 = vmatpush.msra.mxu2 %v1150_v1  ;;  %v1153_v9 = vld [vmem:[%s1795_s3 + $0x20] sm:$0xff]  ;;  %515 = vmatpush.msra.mxu1 %v498_v6  ;;  %v1165_v10 = vld [vmem:[%s1797_s1 + $0x38] sm:$0xff]  ;;  %v496_v11 = vld [vmem:[%s1794_s2 + $0x8] sm:$0xff]  ;;  %s1620_s29 = scalar_lea.vmem [#allocation7], %s1144_s22  ;;  %s1181_s26 = sshll.u32 %s1368_s16, 4 }
  0x23   : > { %595 = vmatpush.msra.mxu3 %v1155_v3  ;;  %v610_v12 = vld [vmem:[%s1797_s1 + $0x18] sm:$0xff]  ;;  %v1556_v13 = vld [vmem:[%s489_s21] sm:$0xff]  ;;  %v1164_v14 = vld [vmem:[%s1797_s1 + $0x30] sm:$0xff]  ;;  %s1026_s19 = scalar_lea.hbm %s1776_s14, %s1181_s26  ;;  %s1027_s21 = sshll.u32 %s1620_s29, 4  ;;  %s1028_s21 = int_to_ptr.vmem [resolvable:$true] %s1027_s21 }
  0x24   : > { %569 = vmatpush.msra.mxu2 %v1149_v4  ;;  %516 = vmatpush.msra.mxu1 %v497_v7  ;;  %v495_v15 = vld [vmem:[%s1794_s2] sm:$0xff]  ;;  %v609_v16 = vld [vmem:[%s1797_s1 + $0x10] sm:$0xff]  ;;  %v608_v17 = vld [vmem:[%s1797_s1 + $0x8] sm:$0xff]  ;;  %s1029_s20 = sshll.u32 %s1026_s19, 4  ;;  %s999_s24 = scalar_lea.sflag [#allocation8], %s1616_s28  ;;  %s1030_s20 = int_to_ptr.hbm [resolvable:$true] %s1029_s20 }
  0x25   : > { %596 = vmatpush.msra.mxu3 %v1154_v5  ;;  %627 = vmatpush.msra.mxu0 %v610_v12  ;;  %v1163_v18 = vld [vmem:[%s1797_s1 + $0x28] sm:$0xff]  ;;  %v607_v19 = vld [vmem:[%s1797_s1] sm:$0xff]  ;;  %v528_v21 = vld [vmem:[%s1795_s3 + $0x18] sm:$0xff]  ;;  %s1280_s17 = sshra.s32 %s1030_s20, 4  ;;  %s1281_s17 = int_to_ptr.hbm [resolvable:$true] %s1280_s17 }
  0x26   : > { %570 = vmatpush.msra.mxu2 %v1148_v8  ;;  %517 = vmatpush.msra.mxu1 %v496_v11  ;;  %v1162_v20 = vld [vmem:[%s1797_s1 + $0x20] sm:$0xff]  ;;  %v527_v22 = vld [vmem:[%s1795_s3 + $0x10] sm:$0xff]  ;;  %v526_v23 = vld [vmem:[%s1795_s3 + $0x8] sm:$0xff]  ;;  %s1282_s22 = scalar_lea.hbm %s1281_s17, 16  ;;  %s1286_s1 = scalar_lea.hbm %s1776_s14, 32 }
  0x27   : > { %597 = vmatpush.msra.mxu3 %v1153_v9  ;;  %1152 = vmatmul.msk.f32.vlgmr.msra.gmra.mxu2 %vm499_vm0, %v1556_v13  ;;  %v525_v24 = vld [vmem:[%s1795_s3] sm:$0xff]  ;;  %v828_v11 = vld [vmem:[%s1766_s4 + $0x18] sm:$0xff]  ;;  %v827_v12 = vld [vmem:[%s1766_s4 + $0x10] sm:$0xff]  ;;  %p1283_p12 = scmp.ne.s32.totalorder %s1281_s17, %s1282_s22  ;;  %p1287_p1 = scmp.lt.s32.totalorder %s1281_s17, %s1776_s14 }
  0x28   : > { %1157 = vmatmul.msk.f32.vlgmr.msra.gmra.mxu3 %vm499_vm0, %v1556_v13  ;;  %628 = vmatpush.msra.mxu0 %v609_v16  ;;  %p1288_p2 = scmp.lt.s32.totalorder %s1286_s1, %s1282_s22 }
  0x29   : > { %731 = vmatpush.msrb.mxu3 %v1165_v10  ;;  %518 = vmatpush.msra.mxu1 %v495_v15  ;;  %v825_v15 = vld [vmem:[%s1766_s4] sm:$0xff]  ;;  %p1284_p13 = pnand %p1283_p12, %p1497_p4 }
  0x2a   : > { %1146 = vmatmul.msk.f32.vlgmr.msra.gmra.mxu1 %vm499_vm0, %v1556_v13  ;;  %629 = vmatpush.msra.mxu0 %v608_v17  ;;  %p1289_p3 = por %p1288_p2, %p1287_p1 }
  0x2b   : > { %732 = vmatpush.msrb.mxu3 %v1164_v14  ;;  %541 = vmatpush.msrb.mxu1 %v528_v21  ;;  %v826_v14 = vld [vmem:[%s1766_s4 + $0x8] sm:$0xff]  ;;  %v1379_v21 = vmov 32.0   ;;  %p1285_p0 = pneg %p1284_p13 }
  0x2c   : > { %630 = vmatpush.msra.mxu0 %v607_v19 }
  0x2d   : > { %733 = vmatpush.msrb.mxu3 %v1163_v18  ;;  %1158 = vmatmul.msk.f32.vlgmr.msra.gmra.mxu0 %vm499_vm0, %v1556_v13  ;;  %p1290_p5 = pnand %p1289_p3, %p1285_p0 }
  0x2e   : > { %542 = vmatpush.msrb.mxu1 %v527_v22 }
  0x2f   : > { %734 = vmatpush.msrb.mxu3 %v1162_v20 }
  0x30   : > { %1166 = vmatmul.msk.f32.vlgmr.msrb.gmra.mxu3 %vm499_vm0, %v1556_v13  ;;  %543 = vmatpush.msrb.mxu1 %v526_v23 }
  0x32   : > { %544 = vmatpush.msrb.mxu1 %v525_v24 }
  0x33   : > { %1147 = vmatmul.msk.f32.vlgmr.msrb.gmra.mxu1 %vm499_vm0, %v1556_v13 }
  0xa7   : > { %v520_v25 = vpop.f32.mrf.mxu1 }
  0xa8   : > { %524 = vst.msk [vmem:[#allocation2] sm:$0xff] %vm523_vm1, %v520_v25 }
  0xaa   : > { %v572_v26 = vpop.f32.mrf.mxu2  ;;  %v632_v30 = vpop.f32.mrf.mxu0 }
  0xab   : > { %v599_v27 = vpop.f32.mrf.mxu3  ;;  %576 = vst.msk [vmem:[#allocation2 + $0x8] sm:$0xff] %vm523_vm1, %v572_v26 }
  0xac   : > { %603 = vst.msk [vmem:[#allocation3 + $0x8] sm:$0xff] %vm523_vm1, %v599_v27 }
  0xaf   : > { %v635_v28 = vld [vmem:[#allocation2] sm:$0xff] }
  0xb0   : > { %1159 = vmatpush.xpose.msk.msra.mxu1 %vm523_vm1, %v635_v28  ;;  %v546_v33 = vpop.f32.mrf.mxu1 }
  0xb1   : > { %549 = vst.msk [vmem:[#allocation3] sm:$0xff] %vm523_vm1, %v546_v33  ;;  %v893_v33 = vld [vmem:[%s1769_s7 + $0x10] sm:$0xff] }
  0xb2   : > { %v740_v29 = vld [vmem:[#allocation2 + $0x8] sm:$0xff] }
  0xb3   : > { %1167 = vmatpush.xpose.msk.msrb.mxu0 %vm523_vm1, %v740_v29  ;;  %v736_v31 = vpop.f32.mrf.mxu3  ;;  %v794_v32 = vld [vmem:[#allocation3 + $0x8] sm:$0xff]  ;;  %1160 = vmatmul.msk.f32.vlgmr.msra.gmra.mxu1 %vm523_vm1, %v632_v30 }
  0xb4   : > { %813 = vmatpush.msrb.mxu1 %v794_v32  ;;  %v894_v32 = vld [vmem:[%s1769_s7 + $0x18] sm:$0xff] }
  0xb5   : > { %914 = vmatpush.msra.mxu3 %v894_v32 }
  0xb6   : > { %1168 = vmatmul.msk.f32.vlgmr.msrb.gmra.mxu0 %vm523_vm1, %v736_v31 }
  0xb7   : > { %915 = vmatpush.msra.mxu3 %v893_v33 }
  0xb8   : > { %v689_v34 = vld [vmem:[#allocation3] sm:$0xff] }
  0xb9   : > { %708 = vmatpush.msrb.mxu2 %v689_v34  ;;  %v892_v34 = vld [vmem:[%s1769_s7 + $0x8] sm:$0xff] }
  0xba   : > { %916 = vmatpush.msra.mxu3 %v892_v34 }
  0xbb   : > { %844 = vmatpush.msra.mxu2 %v828_v11 }
  0xbd   : > { %845 = vmatpush.msra.mxu2 %v827_v12 }
  0xbf   : > { %846 = vmatpush.msra.mxu2 %v826_v14 }
  0xc1   : > { %847 = vmatpush.msra.mxu2 %v825_v15 }
 0x130   : > { %v660_v37 = vpop.f32.mrf.mxu1 }
 0x131   : > { %v664_v38 = vsel %vm663_vm2, %v660_v37, -inf }
 0x133   : > { %v764_v35 = vpop.f32.mrf.mxu0 }
 0x134   : > { %v767_v36 = vsel %vm663_vm2, %v764_v35, -inf }
 0x135   : > { %768 = vmax.xlane.f32.xlu0 %v767_v36  ;;  %v930_v36 = vld [vmem:[%s1771_s9 + $0x38] sm:$0xff] }
 0x136   : > { %947 = vmatpush.msra.mxu0 %v930_v36 }
 0x13d   : > { %665 = vmax.xlane.f32.xlu0 %v664_v38  ;;  %v928_v38 = vld [vmem:[%s1771_s9 + $0x28] sm:$0xff] }
 0x1a8   : > { %v769_v39 = vpop.xlane.xlu0 %768 }
 0x1a9   : > { %v770_v40 = vsub.f32 %v764_v35, %v769_v39  ;;  %v891_v35 = vld [vmem:[%s1769_s7] sm:$0xff] }
 0x1aa   : > { %917 = vmatpush.msra.mxu3 %v891_v35 }
 0x1ab   : > { %v771_v41 = vmul.f32 1.442695, %v770_v40 }
 0x1ad   : > { %1252 = vpow2.f32 %v771_v41  ;;  %v927_v41 = vld [vmem:[%s1771_s9 + $0x20] sm:$0xff] }
 0x1b0   : > { %v666_v42 = vpop.xlane.xlu0 %665 }
 0x1b1   : > { %v667_v43 = vsub.f32 %v660_v37, %v666_v42  ;;  %v929_v37 = vld [vmem:[%s1771_s9 + $0x30] sm:$0xff] }
 0x1b2   : > { %948 = vmatpush.msra.mxu0 %v929_v37 }
 0x1b3   : > { %v1253_v44 = vpop.eup %1252  ;;  %v668_v45 = vmul.f32 1.442695, %v667_v43  ;;  %v926_v43 = vld [vmem:[%s1771_s9 + $0x18] sm:$0xff] }
 0x1b4   : > { %v773_v46 = vsel %vm663_vm2, %v1253_v44, 0.0  ;;  %949 = vmatpush.msra.mxu0 %v928_v38 }
 0x1b5   : > { %1254 = vpow2.f32 %v668_v45  ;;  %774 = vadd.xlane.f32.xlu1 %v773_v46 }
 0x1b6   : > { %950 = vmatpush.msra.mxu0 %v927_v41 }
 0x1b8   : > { %951 = vmatpush.msra.mxu0 %v926_v43 }
 0x1bb   : > { %v1255_v47 = vpop.eup %1254 }
 0x1bc   : > { %v670_v48 = vsel %vm663_vm2, %v1255_v47, 0.0 }
 0x1bd   : > { %671 = vadd.xlane.f32.xlu1 %v670_v48 }
 0x228   : > { %v775_v49 = vpop.xlane.xlu1 %774 }
 0x229   : > { %1256 = vrcp.f32 %v775_v49  ;;  %v787_v54 = vand.u32 2147483648, %v775_v49  ;;  %v785_v56 = vand.u32 2147483647, %v775_v49  ;;  %vm781_vm4 = vweird.f32 %v775_v49 }
 0x22b   : > { %v788_v59 = vor.u32 1.1754944e-38, %v787_v54  ;;  %vm786_vm6 = vcmp.eq.f32.partialorder %v785_v56, 8.507059e+37  ;;  %v925_v56 = vld [vmem:[%s1771_s9 + $0x10] sm:$0xff] }
 0x22c   : > { %952 = vmatpush.msra.mxu0 %v925_v56 }
 0x22f   : > { %v1257_v50 = vpop.eup %1256 }
 0x230   : > { %v777_v51 = vmul.f32 %v1257_v50, %v775_v49  ;;  %v672_v52 = vpop.xlane.xlu1 %671  ;;  %vm782_vm3 = vweird.f32 %v1257_v50 }
 0x231   : > { %1258 = vrcp.f32 %v672_v52  ;;  %vm783_vm5 = vmor %vm781_vm4, %vm782_vm3  ;;  %v684_v1 = vand.u32 2147483648, %v672_v52  ;;  %v682_v3 = vand.u32 2147483647, %v672_v52  ;;  %vm678_vm8 = vweird.f32 %v672_v52 }
 0x232   : > { %v778_v53 = vsub.f32 1.0, %v777_v51  ;;  %1260 = vrcp.f32 %v1379_v21 }
 0x233   : > { %v685_v5 = vor.u32 1.1754944e-38, %v684_v1  ;;  %vm683_vm10 = vcmp.eq.f32.partialorder %v682_v3, 8.507059e+37 }
 0x234   : > { %v779_v55 = vmul.f32 %v1257_v50, %v778_v53  ;;  %v1247_v53 = vld [vmem:[%s1768_s6] ss:$0 sm:$0xff] }
 0x236   : > { %v780_v57 = vadd.f32 %v1257_v50, %v779_v55 }
 0x237   : > { %v1259_v58 = vpop.eup %1258 }
 0x238   : > { %v784_v60 = vsel %vm783_vm5, %v1257_v50, %v780_v57  ;;  %v674_v61 = vmul.f32 %v1259_v58, %v672_v52  ;;  %vm679_vm7 = vweird.f32 %v1259_v58  ;;  %v1261_v22 = vpop.eup %1260  ;;  %v1246_v50 = vld [vmem:[%s1767_s5] ss:$0 sm:$0xff]  ;;  %v924_v57 = vld [vmem:[%s1771_s9 + $0x8] sm:$0xff] }
 0x239   : > { %v789_v62 = vsel %vm786_vm6, %v788_v59, %v784_v60  ;;  %vm680_vm9 = vmor %vm678_vm8, %vm679_vm7  ;;  %v858_v23 = vmul.f32 32.0, %v1261_v22  ;;  %vm862_vm12 = vweird.f32 %v1261_v22  ;;  %953 = vmatpush.msra.mxu0 %v924_v57  ;;  %v1248_v59 = vld [vmem:[%s1770_s8] ss:$0 sm:$0xff] }
 0x23a   : > { %v675_v63 = vsub.f32 1.0, %v674_v61  ;;  %v790_v0 = vmul.f32 %v1253_v44, %v789_v62 }
 0x23b   : > { %v859_v24 = vsub.f32 1.0, %v858_v23 }
 0x23c   : > { %v676_v2 = vmul.f32 %v1259_v58, %v675_v63  ;;  %1170 = vmatmul.msk.f32.vlgmr.msrb.gmra.mxu1 %vm663_vm2, %v790_v0  ;;  %1169 = vst.msk [vmem:[%s1620_s29 + $0x8] sm:$0xff] %vm663_vm2, %v790_v0  ;;  %v1249_v63 = vld [vmem:[%s1772_s10] ss:$0 sm:$0xff] }
 0x23d   : > { %v860_v25 = vmul.f32 %v1261_v22, %v859_v24 }
 0x23e   : > { %v677_v4 = vadd.f32 %v1259_v58, %v676_v2 }
 0x23f   : > { %v861_v26 = vadd.f32 %v1261_v22, %v860_v25 }
 0x240   : > { %v681_v6 = vsel %vm680_vm9, %v1259_v58, %v677_v4  ;;  %v923_v58 = vld [vmem:[%s1771_s9] sm:$0xff] }
 0x241   : > { %v686_v7 = vsel %vm683_vm10, %v685_v5, %v681_v6  ;;  %v1643_v27 = vsel %vm862_vm12, %v1261_v22, %v861_v26  ;;  %954 = vmatpush.msra.mxu0 %v923_v58 }
 0x242   : > { %v687_v8 = vmul.f32 %v1255_v47, %v686_v7 }
 0x244   : > { %1161 = vmatmul.msk.f32.vlgmr.msrb.gmra.mxu2 %vm663_vm2, %v687_v8  ;;  %688 = vst.msk [vmem:[%s1620_s29] sm:$0xff] %vm663_vm2, %v687_v8 }
 0x2b9   : > { %v815_v9 = vpop.f32.mrf.mxu1 }
 0x2ba   : > { %819 = vrot.lane.b32.xlu2 %v815_v9, %s1378_s27 }
 0x2c7   : > { %v710_v10 = vpop.f32.mrf.mxu2 }
 0x2c8   : > { %713 = vst.msk [vmem:[#allocation4] sm:$0xff] %vm523_vm1, %v710_v10  ;;  %vm935_vm1 = vcmask 523264  }
 0x314   : > { %v820_v16 = vpop.permute.xlu2 %819 }
 0x315   : > { %823 = vst.msk [vmem:[#allocation4] sm:$0xff] %vm822_vm11, %v820_v16 }
 0x31c   : > { %v824_v17 = vld [vmem:[#allocation4] sm:$0xff] }
 0x31d   : > { %1171 = vmatmul.msk.f32.vlgmr.msra.gmra.mxu2 %vm499_vm0, %v824_v17 }
 0x3a0   : > { %v849_v18 = vpop.f32.mrf.mxu2 }
 0x3a1   : > { %v850_v19 = vadd.f32 %v849_v18, %v1556_v13 }
 0x3a3   : > { %v854_v20 = vsel %vm499_vm0, %v850_v19, 0.0 }
 0x3a4   : > { %855 = vadd.xlane.f32.xlu2 %v854_v20 }
 0x417   : > { %v856_v28 = vpop.xlane.xlu2 %855 }
 0x418   : > { %v864_v29 = vmul.f32 %v1643_v27, %v856_v28 }
 0x41a   : > { %v865_v30 = vsub.f32 %v850_v19, %v864_v29 }
 0x41c   : > { %v866_v31 = vmul.f32 %v865_v30, %v865_v30 }
 0x41e   : > { %v867_v13 = vsel %vm499_vm0, %v866_v31, 0.0 }
 0x41f   : > { %868 = vadd.xlane.f32.xlu0 %v867_v13 }
 0x492   : > { %v869_v39 = vpop.xlane.xlu0 %868 }
 0x493   : > { %v870_v40 = vmul.f32 %v869_v39, %v1643_v27 }
 0x495   : > { %v871_v42 = vadd.f32 1e-06, %v870_v40 }
 0x497   : > { %1262 = vrsqrt.f32 %v871_v42  ;;  %vm878_vm14 = vweird.f32 %v871_v42 }
 0x49d   : > { %v1263_v44 = vpop.eup %1262 }
 0x49e   : > { %v873_v45 = vmul.f32 %v1263_v44, %v871_v42  ;;  %vm879_vm13 = vweird.f32 %v1263_v44 }
 0x49f   : > { %vm880_vm15 = vmor %vm878_vm14, %vm879_vm13 }
 0x4a0   : > { %v874_v46 = vmul.f32 %v1263_v44, %v873_v45 }
 0x4a2   : > { %v875_v47 = vmul.f32 0.5, %v874_v46 }
 0x4a4   : > { %v876_v48 = vsub.f32 1.5, %v875_v47 }
 0x4a6   : > { %v877_v49 = vmul.f32 %v1263_v44, %v876_v48 }
 0x4a8   : > { %v881_v51 = vsel %vm880_vm15, %v1263_v44, %v877_v49 }
 0x4a9   : > { %v882_v52 = vmul.f32 %v881_v51, %v865_v30 }
 0x4ab   : > { %v886_v54 = vmul.f32 %v1246_v50, %v882_v52 }
 0x4ad   : > { %v890_v55 = vadd.f32 %v1247_v53, %v886_v54 }
 0x4af   : > { %1172 = vmatmul.msk.f32.vlgmr.msra.gmra.mxu3 %vm499_vm0, %v890_v55 }
 0x532   : > { %v919_v60 = vpop.f32.mrf.mxu3 }
 0x533   : > { %v920_v61 = vadd.f32 %v1248_v59, %v919_v60 }
 0x535   : > { %v922_v62 = vmax.f32 %v920_v61, 0.0 }
 0x537   : > { %1173 = vmatmul.msk.f32.vlgmr.msra.gmra.mxu0 %vm935_vm1, %v922_v62 }
 0x5b4   : > { %v956_v0 = vpop.f32.mrf.mxu0 }
 0x5b5   : > { %v957_v1 = vadd.f32 %v1249_v63, %v956_v0 }
 0x5b7   : > { %v959_v2 = vadd.f32 %v957_v1, %v890_v55 }
 0x5b9   : > { %v962_v3 = vsel %vm499_vm0, %v959_v2, 0.0 }
 0x5ba   : > { %963 = vadd.xlane.f32.xlu1 %v962_v3 }
 0x62d   : > { %v964_v4 = vpop.xlane.xlu1 %963 }
 0x62e   : > { %v965_v5 = vmul.f32 %v964_v4, %v1643_v27 }
 0x630   : > { %v966_v6 = vsub.f32 %v959_v2, %v965_v5 }
 0x632   : > { %v967_v7 = vmul.f32 %v966_v6, %v966_v6 }
 0x634   : > { %v968_v8 = vsel %vm499_vm0, %v967_v7, 0.0 }
 0x635   : > { %969 = vadd.xlane.f32.xlu0 %v968_v8 }
 0x636   : > { %1293 = shalt.err (!%p1290_p5)
}
 0x637   : > { %s1380_s29 = smov 128   ;;  %s1381_s26 = smov 8   ;;  %v1250_v19 = vld [vmem:[%s1773_s11] ss:$0 sm:$0xff] }
 0x638   : > { %1183 = dma.vmem_to_hbm [thread:$0]  (%p1497_p4), %s1028_s21, 256, %s1030_s20, %s999_s24, %s1380_s29, %s1380_s29, %s1381_s26  }
 0x639   : > { %s1143_s0 = sshll.u32 %s1616_s28, 3  ;;  %s1176_s1 = sshll.u32 %s1368_s16, 3  ;;  %v1251_v22 = vld [vmem:[%s1774_s12] ss:$0 sm:$0xff] }
 0x63a   : > { %s1010_s19 = scalar_lea.hbm %s1775_s13, %s1176_s1  ;;  %s478_s16 = scalar_lea.vmem [#allocation5], %s1143_s0 }
 0x63b   : > { %s1012_s24 = sshll.u32 %s478_s16, 4  ;;  %s1014_s17 = sshll.u32 %s1010_s19, 4  ;;  %s1013_s24 = int_to_ptr.vmem [resolvable:$true] %s1012_s24  ;;  %s1015_s17 = int_to_ptr.hbm [resolvable:$true] %s1014_s17 }
 0x63c   : > { %s994_s22 = scalar_lea.sflag [#allocation6], %s1616_s28  ;;  %s1308_s27 = sshra.s32 %s1015_s17, 4  ;;  %s1309_s27 = int_to_ptr.hbm [resolvable:$true] %s1308_s27 }
 0x63d   : > { %s1310_s29 = scalar_lea.hbm %s1309_s27, 8  ;;  %s1314_s0 = scalar_lea.hbm %s1775_s13, 16 }
 0x63e   : > { %p1311_p6 = scmp.ne.s32.totalorder %s1309_s27, %s1310_s29  ;;  %p1315_p10 = scmp.lt.s32.totalorder %s1309_s27, %s1775_s13 }
 0x63f   : > { %p1316_p11 = scmp.lt.s32.totalorder %s1314_s0, %s1310_s29 }
 0x640   : > { %p1312_p7 = pnand %p1311_p6, %p1497_p4 }
 0x641   : > { %p1317_p12 = por %p1316_p11, %p1315_p10 }
 0x642   : > { %p1313_p9 = pneg %p1312_p7 }
 0x644   : > { %p1318_p13 = pnand %p1317_p12, %p1313_p9 }
 0x6a8   : > { %v970_v9 = vpop.xlane.xlu0 %969 }
 0x6a9   : > { %v971_v10 = vmul.f32 %v970_v9, %v1643_v27 }
 0x6ab   : > { %v972_v11 = vadd.f32 1e-06, %v971_v10 }
 0x6ad   : > { %1264 = vrsqrt.f32 %v972_v11  ;;  %vm979_vm3 = vweird.f32 %v972_v11 }
 0x6b3   : > { %v1265_v12 = vpop.eup %1264 }
 0x6b4   : > { %v974_v14 = vmul.f32 %v1265_v12, %v972_v11  ;;  %vm980_vm2 = vweird.f32 %v1265_v12 }
 0x6b5   : > { %vm981_vm4 = vmor %vm979_vm3, %vm980_vm2 }
 0x6b6   : > { %v975_v15 = vmul.f32 %v1265_v12, %v974_v14 }
 0x6b8   : > { %v976_v16 = vmul.f32 0.5, %v975_v15 }
 0x6ba   : > { %v977_v17 = vsub.f32 1.5, %v976_v16 }
 0x6bc   : > { %v978_v18 = vmul.f32 %v1265_v12, %v977_v17 }
 0x6be   : > { %v982_v20 = vsel %vm981_vm4, %v1265_v12, %v978_v18 }
 0x6bf   : > { %v983_v21 = vmul.f32 %v982_v20, %v966_v6 }
 0x6c1   : > { %v987_v23 = vmul.f32 %v1250_v19, %v983_v21 }
 0x6c3   : > { %v991_v24 = vadd.f32 %v1251_v22, %v987_v23 }
 0x6c5   : > { %992 = vst.msk [vmem:[%s478_s16] sm:$0xff] %vm499_vm0, %v991_v24 }
 0x6c6   : > { %1321 = shalt.err (!%p1318_p13)
}
 0x6c7   : > { %1182 = dma.vmem_to_hbm [thread:$0]  (%p1497_p4), %s1013_s24, 128, %s1015_s17, %s994_s22  }
 0x6c8 PF: > { %s1798_s28 = sld [smem:[#allocation11_spill]]  ;;  %p1193_p0 = scmp.ge.s32.totalorder %s1376_s18, 2 }
 0x6ca   : > { %p1187_p1 = pnand %p1193_p0, %p1504_p8 }
 0x6cc   : > { %p1188_p2 = pneg %p1187_p1 }
 0x6ce   : > { %s1044_s25 = sand.u32 1, %s1798_s28  }
 0x6cf   : > { %s1045_s19 = scalar_lea.sflag [#allocation6], %s1044_s25 }
 0x6d0   : > { %1347 = dma.done.wait (%p1188_p2), %s1045_s19, 128  }
 0x6d1   : > { %1349 = vsyncadd (%p1188_p2), %s1045_s19, 4294967168  ;;  %s1055_s21 = scalar_lea.sflag [#allocation8], %s1044_s25 }
 0x6d2   : > { %1351 = dma.done.wait (%p1188_p2), %s1055_s21, 256  }
 0x6d3   : > { %1353 = vsyncadd (%p1188_p2), %s1055_s21, 4294967040  ;;  %s31_s18 = sadd.s32 1, %s1376_s18   ;;  %s1800_s23 = sld [smem:[#allocation12_spill]] }
 0x6d4   : > { %p28_p3 = scmp.ge.s32.totalorder %s31_s18, 4   ;;  %s1801_s15 = sld [smem:[#allocation16_spill]] }
 0x6d5   : > { %s1802_s16 = sld [smem:[#allocation13_spill]]  ;;  %s1804_s29 = smov %s1360_s30 }
 0x6d6   : > { %s1803_s17 = sld [smem:[#allocation14_spill]]  ;;  %30 = sbr.rel (!%p28_p3) target bundleno = 11 (0xb), region = 137 }
 0x6d9   : > { %s1805_s30 = smov %s1800_s23 }
 0x6db   :  { %1061 = vsyncpa [#allocation6], 1 }
 0x6dc   :  { %1063 = vsyncpa [#allocation6 + $0x1], 1 }
 0x6dd   :  { %1064 = vsyncpa [#allocation8], 1 }
 0x6de   :  { %1066 = vsyncpa [#allocation8 + $0x1], 1 }

// kernel: tpu_custom_call.1
= control target key start
LH: loop header
LB: loop body
LE: loop exit
PB: predicated region body
PF: predicated region fallthrough
CT: control target
= control target key end

     0   :  { %s1762_s0 = inlined_call_operand.vmem [shape: f32[2,8,32], index: 0, kind: input, shape index: {}]   ;;  %s1763_s1 = inlined_call_operand.vmem [shape: f32[2,32,16], index: 1, kind: input, shape index: {}]   ;;  %s1764_s2 = inlined_call_operand.vmem [shape: f32[2,32,16], index: 2, kind: input, shape index: {}]   ;;  %s1765_s3 = inlined_call_operand.vmem [shape: f32[2,32,16], index: 3, kind: input, shape index: {}]   ;;  %s1766_s4 = inlined_call_operand.vmem [shape: f32[32,32], index: 4, kind: input, shape index: {}]   ;;  %s1767_s5 = inlined_call_operand.vmem [shape: f32[1,32], index: 5, kind: input, shape index: {}]   ;;  %s1768_s6 = inlined_call_operand.vmem [shape: f32[1,32], index: 6, kind: input, shape index: {}]   ;;  %s1769_s7 = inlined_call_operand.vmem [shape: f32[32,64], index: 7, kind: input, shape index: {}]   ;;  %s1770_s8 = inlined_call_operand.vmem [shape: f32[1,64], index: 8, kind: input, shape index: {}]   ;;  %s1771_s9 = inlined_call_operand.vmem [shape: f32[64,32], index: 9, kind: input, shape index: {}]   ;;  %s1772_s10 = inlined_call_operand.vmem [shape: f32[1,32], index: 10, kind: input, shape index: {}]   ;;  %s1773_s11 = inlined_call_operand.vmem [shape: f32[1,32], index: 11, kind: input, shape index: {}]   ;;  %s1774_s12 = inlined_call_operand.vmem [shape: f32[1,32], index: 12, kind: input, shape index: {}]   ;;  %s1775_s13 = inlined_call_operand.hbm [shape: f32[2,8,32], index: 13, kind: output, shape index: {0}]   ;;  %s1776_s14 = inlined_call_operand.hbm [shape: f32[2,2,8,8], index: 14, kind: output, shape index: {1}]  }
   0x1   :  { %1782 = sst [smem:[#allocation17_spill]] %s1762_s0 }
   0x2   :  { %1783 = sst [smem:[#allocation18_spill]] %s1763_s1 }
   0x3   :  { %1784 = sst [smem:[#allocation19_spill]] %s1764_s2 }
   0x4   :  { %1785 = sst [smem:[#allocation20_spill]] %s1765_s3 }
   0x5   :  { %20 = vsyncpa [#allocation6], 0 }
   0x6   :  { %22 = vsyncpa [#allocation6 + $0x1], 0 }
   0x7   :  { %23 = vsyncpa [#allocation8], 0 }
   0x8   :  { %25 = vsyncpa [#allocation8 + $0x1], 0  ;;  %s1457_s29 = smov 0   ;;  %s1459_s30 = smov 0  }
   0x9   :  { %s1461_s15 = smov 0   ;;  %s1463_s16 = smov 0  }
   0xa   :  { %s1465_s17 = smov 0   ;;  %s1467_s18 = smov 0  }
   0xb LB: > { %1786 = sst [smem:[#allocation11_spill]] %s1356_s29  ;;  %s1138_s19 = sadd.s32 4294967295, %s1376_s18   ;;  %s1376_s18 = sphi %s1467_s18, %s31_s18   ;;  %s1372_s17 = sphi %s1465_s17, %s1803_s17   ;;  %s1368_s16 = sphi %s1463_s16, %s1802_s16   ;;  %s1364_s15 = sphi %s1461_s15, %s1801_s15   ;;  %s1360_s30 = sphi %s1459_s30, %s1805_s30   ;;  %s1356_s29 = sphi %s1457_s29, %s1804_s29  }
   0xc   : > { %1787 = sst [smem:[#allocation12_spill]] %s1364_s15  ;;  %s1139_s20 = sadd.s32 4294967294, %s1376_s18  }
   0xd   : > { %1788 = sst [smem:[#allocation13_spill]] %s1372_s17  ;;  %s43_s21 = sadd.s32 1, %s1372_s17 }
   0xe   : > { %s330_s22 = sadd.s32 1, %s1364_s15  ;;  %p45_p0 = scmp.ge.s32.totalorder %s43_s21, 2 }
   0xf   : > { %p340_p1 = scmp.ne.s32.totalorder %s1364_s15, %s1360_s30  ;;  %p341_p2 = scmp.eq.s32.totalorder %s1138_s19, 1 }
  0x10   : > { %p346_p3 = scmp.ne.s32.totalorder %s1360_s30, %s1356_s29  ;;  %s1807_s21 = smov (%p45_p0, %s43_s21), 0 }
  0x11   : > { %1789 = sst [smem:[#allocation14_spill]] %s1807_s21  ;;  %p1497_p4 = por %p341_p2, %p340_p1 }
  0x12   : > { %p347_p5 = scmp.eq.s32.totalorder %s1139_s20, 1  ;;  %s325_s24 = ssub.s32 %s1372_s17, %s1807_s21 }
  0x13   : > { %p1142_p6 = scmp.ge.s32.totalorder %s1376_s18, 1  ;;  %p328_p7 = scmp.eq.s32.totalorder %s325_s24, 0 }
  0x14   : > { %p1504_p8 = por %p347_p5, %p346_p3  ;;  %p436_p9 = scmp.lt.s32.totalorder %s1376_s18, 3 }
  0x15   : > { %s1510_s26 = scalar_select %p328_p7, %s1364_s15, %s330_s22  }
  0x16   : > { %s1791_s25 = scalar_select %p1504_p8, 1, 0 }
  0x17   : > { %1793 = sst [smem:[#allocation16_spill]] %s1510_s26  ;;  %p437_p10 = pnand %p1142_p6, %p436_p9 }
  0x18   : > { %1792 = sst [smem:[#allocation15_spill]] %s1791_s25  ;;  %p486_p11 = scmp.lt.s32.totalorder (!%p437_p10), %s1368_s16, 1 }
  0x19   : > { %440 = sbr.rel (%p437_p10) target bundleno = 1736 (0x6c8), region = 72  ;;  %s1794_s2 = sld [smem:[#allocation19_spill]] (!%p437_p10) }
  0x1a   : > { %s1795_s3 = sld [smem:[#allocation20_spill]] (!%p437_p10)  ;;  %s1378_s27 = smov (!%p437_p10), 16  }
  0x1b   : > { %s1796_s0 = sld [smem:[#allocation17_spill]] (!%p437_p10) }
  0x1c   : > { %s1797_s1 = sld [smem:[#allocation18_spill]] (!%p437_p10) }
  0x1e   : > { %s487_s28 = scalar_select %p486_p11, %s1368_s16, 1  ;;  %vm499_vm0 = vcmask 261120   ;;  %vm523_vm1 = vcmask 130048   ;;  %vm663_vm2 = vcmask 64512   ;;  %vm822_vm11 = vcmask 261248  }
  0x1f   : > { %v1151_v0 = vld [vmem:[%s1794_s2 + $0x38] sm:$0xff]  ;;  %v1150_v1 = vld [vmem:[%s1794_s2 + $0x30] sm:$0xff]  ;;  %v1149_v4 = vld [vmem:[%s1794_s2 + $0x28] sm:$0xff] }
  0x20   : > { %v1156_v2 = vld [vmem:[%s1795_s3 + $0x38] sm:$0xff]  ;;  %567 = vmatpush.msra.mxu2 %v1151_v0  ;;  %v1155_v3 = vld [vmem:[%s1795_s3 + $0x30] sm:$0xff]  ;;  %v1154_v5 = vld [vmem:[%s1795_s3 + $0x28] sm:$0xff]  ;;  %s1145_s26 = sshll.u32 %s487_s28, 3  ;;  %s1616_s28 = sand.u32 1, %s1360_s30  }
  0x21   : > { %594 = vmatpush.msra.mxu3 %v1156_v2  ;;  %v498_v6 = vld [vmem:[%s1794_s2 + $0x18] sm:$0xff]  ;;  %v497_v7 = vld [vmem:[%s1794_s2 + $0x10] sm:$0xff]  ;;  %v1148_v8 = vld [vmem:[%s1794_s2 + $0x20] sm:$0xff]  ;;  %s489_s21 = scalar_lea.vmem %s1796_s0, %s1145_s26  ;;  %s1144_s22 = sshll.u32 %s1616_s28, 4 }
  0x22   : > { %568 = vmatpush.msra.mxu2 %v1150_v1  ;;  %v1153_v9 = vld [vmem:[%s1795_s3 + $0x20] sm:$0xff]  ;;  %515 = vmatpush.msra.mxu1 %v498_v6  ;;  %v1165_v10 = vld [vmem:[%s1797_s1 + $0x38] sm:$0xff]  ;;  %v496_v11 = vld [vmem:[%s1794_s2 + $0x8] sm:$0xff]  ;;  %s1620_s29 = scalar_lea.vmem [#allocation7], %s1144_s22  ;;  %s1181_s26 = sshll.u32 %s1368_s16, 4 }
  0x23   : > { %595 = vmatpush.msra.mxu3 %v1155_v3  ;;  %v610_v12 = vld [vmem:[%s1797_s1 + $0x18] sm:$0xff]  ;;  %v1556_v13 = vld [vmem:[%s489_s21] sm:$0xff]  ;;  %v1164_v14 = vld [vmem:[%s1797_s1 + $0x30] sm:$0xff]  ;;  %s1026_s19 = scalar_lea.hbm %s1776_s14, %s1181_s26  ;;  %s1027_s21 = sshll.u32 %s1620_s29, 4  ;;  %s1028_s21 = int_to_ptr.vmem [resolvable:$true] %s1027_s21 }
  0x24   : > { %569 = vmatpush.msra.mxu2 %v1149_v4  ;;  %516 = vmatpush.msra.mxu1 %v497_v7  ;;  %v495_v15 = vld [vmem:[%s1794_s2] sm:$0xff]  ;;  %v609_v16 = vld [vmem:[%s1797_s1 + $0x10] sm:$0xff]  ;;  %v608_v17 = vld [vmem:[%s1797_s1 + $0x8] sm:$0xff]  ;;  %s1029_s20 = sshll.u32 %s1026_s19, 4  ;;  %s999_s24 = scalar_lea.sflag [#allocation8], %s1616_s28  ;;  %s1030_s20 = int_to_ptr.hbm [resolvable:$true] %s1029_s20 }
  0x25   : > { %596 = vmatpush.msra.mxu3 %v1154_v5  ;;  %627 = vmatpush.msra.mxu0 %v610_v12  ;;  %v1163_v18 = vld [vmem:[%s1797_s1 + $0x28] sm:$0xff]  ;;  %v607_v19 = vld [vmem:[%s1797_s1] sm:$0xff]  ;;  %v528_v21 = vld [vmem:[%s1795_s3 + $0x18] sm:$0xff]  ;;  %s1280_s17 = sshra.s32 %s1030_s20, 4  ;;  %s1281_s17 = int_to_ptr.hbm [resolvable:$true] %s1280_s17 }
  0x26   : > { %570 = vmatpush.msra.mxu2 %v1148_v8  ;;  %517 = vmatpush.msra.mxu1 %v496_v11  ;;  %v1162_v20 = vld [vmem:[%s1797_s1 + $0x20] sm:$0xff]  ;;  %v527_v22 = vld [vmem:[%s1795_s3 + $0x10] sm:$0xff]  ;;  %v526_v23 = vld [vmem:[%s1795_s3 + $0x8] sm:$0xff]  ;;  %s1282_s22 = scalar_lea.hbm %s1281_s17, 16  ;;  %s1286_s1 = scalar_lea.hbm %s1776_s14, 32 }
  0x27   : > { %597 = vmatpush.msra.mxu3 %v1153_v9  ;;  %1152 = vmatmul.msk.f32.vlgmr.msra.gmra.mxu2 %vm499_vm0, %v1556_v13  ;;  %v525_v24 = vld [vmem:[%s1795_s3] sm:$0xff]  ;;  %v828_v11 = vld [vmem:[%s1766_s4 + $0x18] sm:$0xff]  ;;  %v827_v12 = vld [vmem:[%s1766_s4 + $0x10] sm:$0xff]  ;;  %p1283_p12 = scmp.ne.s32.totalorder %s1281_s17, %s1282_s22  ;;  %p1287_p1 = scmp.lt.s32.totalorder %s1281_s17, %s1776_s14 }
  0x28   : > { %1157 = vmatmul.msk.f32.vlgmr.msra.gmra.mxu3 %vm499_vm0, %v1556_v13  ;;  %628 = vmatpush.msra.mxu0 %v609_v16  ;;  %p1288_p2 = scmp.lt.s32.totalorder %s1286_s1, %s1282_s22 }
  0x29   : > { %731 = vmatpush.msrb.mxu3 %v1165_v10  ;;  %518 = vmatpush.msra.mxu1 %v495_v15  ;;  %v825_v15 = vld [vmem:[%s1766_s4] sm:$0xff]  ;;  %p1284_p13 = pnand %p1283_p12, %p1497_p4 }
  0x2a   : > { %1146 = vmatmul.msk.f32.vlgmr.msra.gmra.mxu1 %vm499_vm0, %v1556_v13  ;;  %629 = vmatpush.msra.mxu0 %v608_v17  ;;  %p1289_p3 = por %p1288_p2, %p1287_p1 }
  0x2b   : > { %732 = vmatpush.msrb.mxu3 %v1164_v14  ;;  %541 = vmatpush.msrb.mxu1 %v528_v21  ;;  %v826_v14 = vld [vmem:[%s1766_s4 + $0x8] sm:$0xff]  ;;  %v1379_v21 = vmov 32.0   ;;  %p1285_p0 = pneg %p1284_p13 }
  0x2c   : > { %630 = vmatpush.msra.mxu0 %v607_v19 }
  0x2d   : > { %733 = vmatpush.msrb.mxu3 %v1163_v18  ;;  %1158 = vmatmul.msk.f32.vlgmr.msra.gmra.mxu0 %vm499_vm0, %v1556_v13  ;;  %p1290_p5 = pnand %p1289_p3, %p1285_p0 }
  0x2e   : > { %542 = vmatpush.msrb.mxu1 %v527_v22 }
  0x2f   : > { %734 = vmatpush.msrb.mxu3 %v1162_v20 }
  0x30   : > { %1166 = vmatmul.msk.f32.vlgmr.msrb.gmra.mxu3 %vm499_vm0, %v1556_v13  ;;  %543 = vmatpush.msrb.mxu1 %v526_v23 }
  0x32   : > { %544 = vmatpush.msrb.mxu1 %v525_v24 }
  0x33   : > { %1147 = vmatmul.msk.f32.vlgmr.msrb.gmra.mxu1 %vm499_vm0, %v1556_v13 }
  0xa7   : > { %v520_v25 = vpop.f32.mrf.mxu1 }
  0xa8   : > { %524 = vst.msk [vmem:[#allocation2] sm:$0xff] %vm523_vm1, %v520_v25 }
  0xaa   : > { %v572_v26 = vpop.f32.mrf.mxu2  ;;  %v632_v30 = vpop.f32.mrf.mxu0 }
  0xab   : > { %v599_v27 = vpop.f32.mrf.mxu3  ;;  %576 = vst.msk [vmem:[#allocation2 + $0x8] sm:$0xff] %vm523_vm1, %v572_v26 }
  0xac   : > { %603 = vst.msk [vmem:[#allocation3 + $0x8] sm:$0xff] %vm523_vm1, %v599_v27 }
  0xaf   : > { %v635_v28 = vld [vmem:[#allocation2] sm:$0xff] }
  0xb0   : > { %1159 = vmatpush.xpose.msk.msra.mxu1 %vm523_vm1, %v635_v28  ;;  %v546_v33 = vpop.f32.mrf.mxu1 }
  0xb1   : > { %549 = vst.msk [vmem:[#allocation3] sm:$0xff] %vm523_vm1, %v546_v33  ;;  %v893_v33 = vld [vmem:[%s1769_s7 + $0x10] sm:$0xff] }
  0xb2   : > { %v740_v29 = vld [vmem:[#allocation2 + $0x8] sm:$0xff] }
  0xb3   : > { %1167 = vmatpush.xpose.msk.msrb.mxu0 %vm523_vm1, %v740_v29  ;;  %v736_v31 = vpop.f32.mrf.mxu3  ;;  %v794_v32 = vld [vmem:[#allocation3 + $0x8] sm:$0xff]  ;;  %1160 = vmatmul.msk.f32.vlgmr.msra.gmra.mxu1 %vm523_vm1, %v632_v30 }
  0xb4   : > { %813 = vmatpush.msrb.mxu1 %v794_v32  ;;  %v894_v32 = vld [vmem:[%s1769_s7 + $0x18] sm:$0xff] }
  0xb5   : > { %914 = vmatpush.msra.mxu3 %v894_v32 }
  0xb6   : > { %1168 = vmatmul.msk.f32.vlgmr.msrb.gmra.mxu0 %vm523_vm1, %v736_v31 }
  0xb7   : > { %915 = vmatpush.msra.mxu3 %v893_v33 }
  0xb8   : > { %v689_v34 = vld [vmem:[#allocation3] sm:$0xff] }
  0xb9   : > { %708 = vmatpush.msrb.mxu2 %v689_v34  ;;  %v892_v34 = vld [vmem:[%s1769_s7 + $0x8] sm:$0xff] }
  0xba   : > { %916 = vmatpush.msra.mxu3 %v892_v34 }
  0xbb   : > { %844 = vmatpush.msra.mxu2 %v828_v11 }
  0xbd   : > { %845 = vmatpush.msra.mxu2 %v827_v12 }
  0xbf   : > { %846 = vmatpush.msra.mxu2 %v826_v14 }
  0xc1   : > { %847 = vmatpush.msra.mxu2 %v825_v15 }
 0x130   : > { %v660_v37 = vpop.f32.mrf.mxu1 }
 0x131   : > { %v664_v38 = vsel %vm663_vm2, %v660_v37, -inf }
 0x133   : > { %v764_v35 = vpop.f32.mrf.mxu0 }
 0x134   : > { %v767_v36 = vsel %vm663_vm2, %v764_v35, -inf }
 0x135   : > { %768 = vmax.xlane.f32.xlu0 %v767_v36  ;;  %v930_v36 = vld [vmem:[%s1771_s9 + $0x38] sm:$0xff] }
 0x136   : > { %947 = vmatpush.msra.mxu0 %v930_v36 }
 0x13d   : > { %665 = vmax.xlane.f32.xlu0 %v664_v38  ;;  %v928_v38 = vld [vmem:[%s1771_s9 + $0x28] sm:$0xff] }
 0x1a8   : > { %v769_v39 = vpop.xlane.xlu0 %768 }
 0x1a9   : > { %v770_v40 = vsub.f32 %v764_v35, %v769_v39  ;;  %v891_v35 = vld [vmem:[%s1769_s7] sm:$0xff] }
 0x1aa   : > { %917 = vmatpush.msra.mxu3 %v891_v35 }
 0x1ab   : > { %v771_v41 = vmul.f32 1.442695, %v770_v40 }
 0x1ad   : > { %1252 = vpow2.f32 %v771_v41  ;;  %v927_v41 = vld [vmem:[%s1771_s9 + $0x20] sm:$0xff] }
 0x1b0   : > { %v666_v42 = vpop.xlane.xlu0 %665 }
 0x1b1   : > { %v667_v43 = vsub.f32 %v660_v37, %v666_v42  ;;  %v929_v37 = vld [vmem:[%s1771_s9 + $0x30] sm:$0xff] }
 0x1b2   : > { %948 = vmatpush.msra.mxu0 %v929_v37 }
 0x1b3   : > { %v1253_v44 = vpop.eup %1252  ;;  %v668_v45 = vmul.f32 1.442695, %v667_v43  ;;  %v926_v43 = vld [vmem:[%s1771_s9 + $0x18] sm:$0xff] }
 0x1b4   : > { %v773_v46 = vsel %vm663_vm2, %v1253_v44, 0.0  ;;  %949 = vmatpush.msra.mxu0 %v928_v38 }
 0x1b5   : > { %1254 = vpow2.f32 %v668_v45  ;;  %774 = vadd.xlane.f32.xlu1 %v773_v46 }
 0x1b6   : > { %950 = vmatpush.msra.mxu0 %v927_v41 }
 0x1b8   : > { %951 = vmatpush.msra.mxu0 %v926_v43 }
 0x1bb   : > { %v1255_v47 = vpop.eup %1254 }
 0x1bc   : > { %v670_v48 = vsel %vm663_vm2, %v1255_v47, 0.0 }
 0x1bd   : > { %671 = vadd.xlane.f32.xlu1 %v670_v48 }
 0x228   : > { %v775_v49 = vpop.xlane.xlu1 %774 }
 0x229   : > { %1256 = vrcp.f32 %v775_v49  ;;  %v787_v54 = vand.u32 2147483648, %v775_v49  ;;  %v785_v56 = vand.u32 2147483647, %v775_v49  ;;  %vm781_vm4 = vweird.f32 %v775_v49 }
 0x22b   : > { %v788_v59 = vor.u32 1.1754944e-38, %v787_v54  ;;  %vm786_vm6 = vcmp.eq.f32.partialorder %v785_v56, 8.507059e+37  ;;  %v925_v56 = vld [vmem:[%s1771_s9 + $0x10] sm:$0xff] }
 0x22c   : > { %952 = vmatpush.msra.mxu0 %v925_v56 }
 0x22f   : > { %v1257_v50 = vpop.eup %1256 }
 0x230   : > { %v777_v51 = vmul.f32 %v1257_v50, %v775_v49  ;;  %v672_v52 = vpop.xlane.xlu1 %671  ;;  %vm782_vm3 = vweird.f32 %v1257_v50 }
 0x231   : > { %1258 = vrcp.f32 %v672_v52  ;;  %vm783_vm5 = vmor %vm781_vm4, %vm782_vm3  ;;  %v684_v1 = vand.u32 2147483648, %v672_v52  ;;  %v682_v3 = vand.u32 2147483647, %v672_v52  ;;  %vm678_vm8 = vweird.f32 %v672_v52 }
 0x232   : > { %v778_v53 = vsub.f32 1.0, %v777_v51  ;;  %1260 = vrcp.f32 %v1379_v21 }
 0x233   : > { %v685_v5 = vor.u32 1.1754944e-38, %v684_v1  ;;  %vm683_vm10 = vcmp.eq.f32.partialorder %v682_v3, 8.507059e+37 }
 0x234   : > { %v779_v55 = vmul.f32 %v1257_v50, %v778_v53  ;;  %v1247_v53 = vld [vmem:[%s1768_s6] ss:$0 sm:$0xff] }
 0x236   : > { %v780_v57 = vadd.f32 %v1257_v50, %v779_v55 }
 0x237   : > { %v1259_v58 = vpop.eup %1258 }
 0x238   : > { %v784_v60 = vsel %vm783_vm5, %v1257_v50, %v780_v57  ;;  %v674_v61 = vmul.f32 %v1259_v58, %v672_v52  ;;  %vm679_vm7 = vweird.f32 %v1259_v58  ;;  %v1261_v22 = vpop.eup %1260  ;;  %v1246_v50 = vld [vmem:[%s1767_s5] ss:$0 sm:$0xff]  ;;  %v924_v57 = vld [vmem:[%s1771_s9 + $0x8] sm:$0xff] }
 0x239   : > { %v789_v62 = vsel %vm786_vm6, %v788_v59, %v784_v60  ;;  %vm680_vm9 = vmor %vm678_vm8, %vm679_vm7  ;;  %v858_v23 = vmul.f32 32.0, %v1261_v22  ;;  %vm862_vm12 = vweird.f32 %v1261_v22  ;;  %953 = vmatpush.msra.mxu0 %v924_v57  ;;  %v1248_v59 = vld [vmem:[%s1770_s8] ss:$0 sm:$0xff] }
 0x23a   : > { %v675_v63 = vsub.f32 1.0, %v674_v61  ;;  %v790_v0 = vmul.f32 %v1253_v44, %v789_v62 }
 0x23b   : > { %v859_v24 = vsub.f32 1.0, %v858_v23 }
 0x23c   : > { %v676_v2 = vmul.f32 %v1259_v58, %v675_v63  ;;  %1170 = vmatmul.msk.f32.vlgmr.msrb.gmra.mxu1 %vm663_vm2, %v790_v0  ;;  %1169 = vst.msk [vmem:[%s1620_s29 + $0x8] sm:$0xff] %vm663_vm2, %v790_v0  ;;  %v1249_v63 = vld [vmem:[%s1772_s10] ss:$0 sm:$0xff] }
 0x23d   : > { %v860_v25 = vmul.f32 %v1261_v22, %v859_v24 }
 0x23e   : > { %v677_v4 = vadd.f32 %v1259_v58, %v676_v2 }
 0x23f   : > { %v861_v26 = vadd.f32 %v1261_v22, %v860_v25 }
 0x240   : > { %v681_v6 = vsel %vm680_vm9, %v1259_v58, %v677_v4  ;;  %v923_v58 = vld [vmem:[%s1771_s9] sm:$0xff] }
 0x241   : > { %v686_v7 = vsel %vm683_vm10, %v685_v5, %v681_v6  ;;  %v1643_v27 = vsel %vm862_vm12, %v1261_v22, %v861_v26  ;;  %954 = vmatpush.msra.mxu0 %v923_v58 }
 0x242   : > { %v687_v8 = vmul.f32 %v1255_v47, %v686_v7 }
 0x244   : > { %1161 = vmatmul.msk.f32.vlgmr.msrb.gmra.mxu2 %vm663_vm2, %v687_v8  ;;  %688 = vst.msk [vmem:[%s1620_s29] sm:$0xff] %vm663_vm2, %v687_v8 }
 0x2b9   : > { %v815_v9 = vpop.f32.mrf.mxu1 }
 0x2ba   : > { %819 = vrot.lane.b32.xlu2 %v815_v9, %s1378_s27 }
 0x2c7   : > { %v710_v10 = vpop.f32.mrf.mxu2 }
 0x2c8   : > { %713 = vst.msk [vmem:[#allocation4] sm:$0xff] %vm523_vm1, %v710_v10  ;;  %vm935_vm1 = vcmask 523264  }
 0x314   : > { %v820_v16 = vpop.permute.xlu2 %819 }
 0x315   : > { %823 = vst.msk [vmem:[#allocation4] sm:$0xff] %vm822_vm11, %v820_v16 }
 0x31c   : > { %v824_v17 = vld [vmem:[#allocation4] sm:$0xff] }
 0x31d   : > { %1171 = vmatmul.msk.f32.vlgmr.msra.gmra.mxu2 %vm499_vm0, %v824_v17 }
 0x3a0   : > { %v849_v18 = vpop.f32.mrf.mxu2 }
 0x3a1   : > { %v850_v19 = vadd.f32 %v849_v18, %v1556_v13 }
 0x3a3   : > { %v854_v20 = vsel %vm499_vm0, %v850_v19, 0.0 }
 0x3a4   : > { %855 = vadd.xlane.f32.xlu2 %v854_v20 }
 0x417   : > { %v856_v28 = vpop.xlane.xlu2 %855 }
 0x418   : > { %v864_v29 = vmul.f32 %v1643_v27, %v856_v28 }
 0x41a   : > { %v865_v30 = vsub.f32 %v850_v19, %v864_v29 }
 0x41c   : > { %v866_v31 = vmul.f32 %v865_v30, %v865_v30 }
 0x41e   : > { %v867_v13 = vsel %vm499_vm0, %v866_v31, 0.0 }
 0x41f   : > { %868 = vadd.xlane.f32.xlu0 %v867_v13 }
 0x492   : > { %v869_v39 = vpop.xlane.xlu0 %868 }
 0x493   : > { %v870_v40 = vmul.f32 %v869_v39, %v1643_v27 }
 0x495   : > { %v871_v42 = vadd.f32 1e-06, %v870_v40 }
 0x497   : > { %1262 = vrsqrt.f32 %v871_v42  ;;  %vm878_vm14 = vweird.f32 %v871_v42 }
 0x49d   : > { %v1263_v44 = vpop.eup %1262 }
 0x49e   : > { %v873_v45 = vmul.f32 %v1263_v44, %v871_v42  ;;  %vm879_vm13 = vweird.f32 %v1263_v44 }
 0x49f   : > { %vm880_vm15 = vmor %vm878_vm14, %vm879_vm13 }
 0x4a0   : > { %v874_v46 = vmul.f32 %v1263_v44, %v873_v45 }
 0x4a2   : > { %v875_v47 = vmul.f32 0.5, %v874_v46 }
 0x4a4   : > { %v876_v48 = vsub.f32 1.5, %v875_v47 }
 0x4a6   : > { %v877_v49 = vmul.f32 %v1263_v44, %v876_v48 }
 0x4a8   : > { %v881_v51 = vsel %vm880_vm15, %v1263_v44, %v877_v49 }
 0x4a9   : > { %v882_v52 = vmul.f32 %v881_v51, %v865_v30 }
 0x4ab   : > { %v886_v54 = vmul.f32 %v1246_v50, %v882_v52 }
 0x4ad   : > { %v890_v55 = vadd.f32 %v1247_v53, %v886_v54 }
 0x4af   : > { %1172 = vmatmul.msk.f32.vlgmr.msra.gmra.mxu3 %vm499_vm0, %v890_v55 }
 0x532   : > { %v919_v60 = vpop.f32.mrf.mxu3 }
 0x533   : > { %v920_v61 = vadd.f32 %v1248_v59, %v919_v60 }
 0x535   : > { %v922_v62 = vmax.f32 %v920_v61, 0.0 }
 0x537   : > { %1173 = vmatmul.msk.f32.vlgmr.msra.gmra.mxu0 %vm935_vm1, %v922_v62 }
 0x5b4   : > { %v956_v0 = vpop.f32.mrf.mxu0 }
 0x5b5   : > { %v957_v1 = vadd.f32 %v1249_v63, %v956_v0 }
 0x5b7   : > { %v959_v2 = vadd.f32 %v957_v1, %v890_v55 }
 0x5b9   : > { %v962_v3 = vsel %vm499_vm0, %v959_v2, 0.0 }
 0x5ba   : > { %963 = vadd.xlane.f32.xlu1 %v962_v3 }
 0x62d   : > { %v964_v4 = vpop.xlane.xlu1 %963 }
 0x62e   : > { %v965_v5 = vmul.f32 %v964_v4, %v1643_v27 }
 0x630   : > { %v966_v6 = vsub.f32 %v959_v2, %v965_v5 }
 0x632   : > { %v967_v7 = vmul.f32 %v966_v6, %v966_v6 }
 0x634   : > { %v968_v8 = vsel %vm499_vm0, %v967_v7, 0.0 }
 0x635   : > { %969 = vadd.xlane.f32.xlu0 %v968_v8 }
 0x636   : > { %1293 = shalt.err (!%p1290_p5)
}
 0x637   : > { %s1380_s29 = smov 128   ;;  %s1381_s26 = smov 8   ;;  %v1250_v19 = vld [vmem:[%s1773_s11] ss:$0 sm:$0xff] }
 0x638   : > { %1183 = dma.vmem_to_hbm [thread:$0]  (%p1497_p4), %s1028_s21, 256, %s1030_s20, %s999_s24, %s1380_s29, %s1380_s29, %s1381_s26  }
 0x639   : > { %s1143_s0 = sshll.u32 %s1616_s28, 3  ;;  %s1176_s1 = sshll.u32 %s1368_s16, 3  ;;  %v1251_v22 = vld [vmem:[%s1774_s12] ss:$0 sm:$0xff] }
 0x63a   : > { %s1010_s19 = scalar_lea.hbm %s1775_s13, %s1176_s1  ;;  %s478_s16 = scalar_lea.vmem [#allocation5], %s1143_s0 }
 0x63b   : > { %s1012_s24 = sshll.u32 %s478_s16, 4  ;;  %s1014_s17 = sshll.u32 %s1010_s19, 4  ;;  %s1013_s24 = int_to_ptr.vmem [resolvable:$true] %s1012_s24  ;;  %s1015_s17 = int_to_ptr.hbm [resolvable:$true] %s1014_s17 }
 0x63c   : > { %s994_s22 = scalar_lea.sflag [#allocation6], %s1616_s28  ;;  %s1308_s27 = sshra.s32 %s1015_s17, 4  ;;  %s1309_s27 = int_to_ptr.hbm [resolvable:$true] %s1308_s27 }
 0x63d   : > { %s1310_s29 = scalar_lea.hbm %s1309_s27, 8  ;;  %s1314_s0 = scalar_lea.hbm %s1775_s13, 16 }
 0x63e   : > { %p1311_p6 = scmp.ne.s32.totalorder %s1309_s27, %s1310_s29  ;;  %p1315_p10 = scmp.lt.s32.totalorder %s1309_s27, %s1775_s13 }
 0x63f   : > { %p1316_p11 = scmp.lt.s32.totalorder %s1314_s0, %s1310_s29 }
 0x640   : > { %p1312_p7 = pnand %p1311_p6, %p1497_p4 }
 0x641   : > { %p1317_p12 = por %p1316_p11, %p1315_p10 }
 0x642   : > { %p1313_p9 = pneg %p1312_p7 }
 0x644   : > { %p1318_p13 = pnand %p1317_p12, %p1313_p9 }
 0x6a8   : > { %v970_v9 = vpop.xlane.xlu0 %969 }
 0x6a9   : > { %v971_v10 = vmul.f32 %v970_v9, %v1643_v27 }
 0x6ab   : > { %v972_v11 = vadd.f32 1e-06, %v971_v10 }
 0x6ad   : > { %1264 = vrsqrt.f32 %v972_v11  ;;  %vm979_vm3 = vweird.f32 %v972_v11 }
 0x6b3   : > { %v1265_v12 = vpop.eup %1264 }
 0x6b4   : > { %v974_v14 = vmul.f32 %v1265_v12, %v972_v11  ;;  %vm980_vm2 = vweird.f32 %v1265_v12 }
 0x6b5   : > { %vm981_vm4 = vmor %vm979_vm3, %vm980_vm2 }
 0x6b6   : > { %v975_v15 = vmul.f32 %v1265_v12, %v974_v14 }
 0x6b8   : > { %v976_v16 = vmul.f32 0.5, %v975_v15 }
 0x6ba   : > { %v977_v17 = vsub.f32 1.5, %v976_v16 }
 0x6bc   : > { %v978_v18 = vmul.f32 %v1265_v12, %v977_v17 }
 0x6be   : > { %v982_v20 = vsel %vm981_vm4, %v1265_v12, %v978_v18 }
 0x6bf   : > { %v983_v21 = vmul.f32 %v982_v20, %v966_v6 }
 0x6c1   : > { %v987_v23 = vmul.f32 %v1250_v19, %v983_v21 }
 0x6c3   : > { %v991_v24 = vadd.f32 %v1251_v22, %v987_v23 }
 0x6c5   : > { %992 = vst.msk [vmem:[%s478_s16] sm:$0xff] %vm499_vm0, %v991_v24 }
 0x6c6   : > { %1321 = shalt.err (!%p1318_p13)
}
 0x6c7   : > { %1182 = dma.vmem_to_hbm [thread:$0]  (%p1497_p4), %s1013_s24, 128, %s1015_s17, %s994_s22  }
 0x6c8 PF: > { %s1798_s28 = sld [smem:[#allocation11_spill]]  ;;  %p1193_p0 = scmp.ge.s32.totalorder %s1376_s18, 2 }
 0x6ca   : > { %p1187_p1 = pnand %p1193_p0, %p1504_p8 }
 0x6cc   : > { %p1188_p2 = pneg %p1187_p1 }
 0x6ce   : > { %s1044_s25 = sand.u32 1, %s1798_s28  }
 0x6cf   : > { %s1045_s19 = scalar_lea.sflag [#allocation6], %s1044_s25 }
 0x6d0   : > { %1347 = dma.done.wait (%p1188_p2), %s1045_s19, 128  }
 0x6d1   : > { %1349 = vsyncadd (%p1188_p2), %s1045_s19, 4294967168  ;;  %s1055_s21 = scalar_lea.sflag [#allocation8], %s1044_s25 }
 0x6d2   : > { %1351 = dma.done.wait (%p1188_p2), %s1055_s21, 256  }
 0x6d3   : > { %1353 = vsyncadd (%p1188_p2), %s1055_s21, 4294967040  ;;  %s31_s18 = sadd.s32 1, %s1376_s18   ;;  %s1800_s23 = sld [smem:[#allocation12_spill]] }
 0x6d4   : > { %p28_p3 = scmp.ge.s32.totalorder %s31_s18, 4   ;;  %s1801_s15 = sld [smem:[#allocation16_spill]] }
 0x6d5   : > { %s1802_s16 = sld [smem:[#allocation13_spill]]  ;;  %s1804_s29 = smov %s1360_s30 }
 0x6d6   : > { %s1803_s17 = sld [smem:[#allocation14_spill]]  ;;  %30 = sbr.rel (!%p28_p3) target bundleno = 11 (0xb), region = 137 }
 0x6d9   : > { %s1805_s30 = smov %s1800_s23 }
 0x6db   :  { %1061 = vsyncpa [#allocation6], 1 }
 0x6dc   :  { %1063 = vsyncpa [#allocation6 + $0x1], 1 }
 0x6dd   :  { %1064 = vsyncpa [#allocation8], 1 }
 0x6de   :  { %1066 = vsyncpa [#allocation8 + $0x1], 1 }

</bundles_post_ra>
